<compile_context>
chip_gen: v7x
topology: tpu7x:2x2x1
jax: 0.10.0
libtpu: 0.0.40
codegen_flags: <defaults>
</compile_context>

<pallas_src>
import functools

import jax
import jax.numpy as jnp
from jax.experimental import pallas as pl
from jax.experimental.pallas import tpu as pltpu


NEG_SLOPE = 0.01   # nn.LeakyReLU default negative_slope
BN_EPS = 1e-5      # nn.BatchNorm1d default eps
OUT_PAD = 128      # lane-dense padded logits width (true logits are [:, :2])


def _leaky_relu(x):
    return jnp.where(x >= 0, x, NEG_SLOPE * x)


def _round_up(n, m):
    return ((n + m - 1) // m) * m


def _choose_bm(B, block_m):
    """Rows per grid step: >=2 steps when possible (v7x megacore), 16-row
    granule for bf16 packing, 256-row granule for big batches."""
    if B <= 32:
        return _round_up(B, 16)
    if B <= 256:
        return min(_round_up(pl.cdiv(B, 2), 16), _round_up(B, 16))
    return min(_round_up(block_m, 256), _round_up(pl.cdiv(B, 2), 256))


# ---------------------------------------------------------------------------
# Kernels: bf16 MXU matmuls, f32 accumulation / bias / LeakyReLU, bf16 store.
# ---------------------------------------------------------------------------
def _fused_kernel(
    x_ref,                 # (BM, E)         f32  (cast to bf16 in-kernel)
    wa_ref, ba_ref,        # (E, 1024) bf16, (1, 1024) f32  [L1@L2 fused + BN1]
    wb_ref, bb_ref,        # (1024, 256) bf16, (1, 256) f32 [L3 + BN2]
    wc_ref, bc_ref,        # (256, 128) bf16, (1, 128) f32  [classifier, padded]
    o_ref,                 # (BM, 128)       bf16
):
    x = x_ref[...].astype(jnp.bfloat16)
    h2 = _leaky_relu(
        jnp.dot(x, wa_ref[...], preferred_element_type=jnp.float32) + ba_ref[...]
    ).astype(jnp.bfloat16)
    h3 = _leaky_relu(
        jnp.dot(h2, wb_ref[...], preferred_element_type=jnp.float32) + bb_ref[...]
    ).astype(jnp.bfloat16)
    out = jnp.dot(h3, wc_ref[...], preferred_element_type=jnp.float32) + bc_ref[...]
    o_ref[...] = out.astype(o_ref.dtype)


def _unfused_kernel(
    x_ref,                 # (BM, E)          f32
    w1_ref, b1_ref,        # (E, 256) bf16,   (1, 256) f32   [LLM_Linear]
    w2_ref, b2_ref,        # (256, 1024) bf16,(1, 1024) f32  [L2 + BN1]
    wb_ref, bb_ref,        # (1024, 256) bf16,(1, 256) f32   [L3 + BN2]
    wc_ref, bc_ref,        # (256, 128) bf16, (1, 128) f32   [classifier, padded]
    o_ref,                 # (BM, 128)        bf16
):
    x = x_ref[...].astype(jnp.bfloat16)
    h1 = (
        jnp.dot(x, w1_ref[...], preferred_element_type=jnp.float32) + b1_ref[...]
    ).astype(jnp.bfloat16)
    h2 = _leaky_relu(
        jnp.dot(h1, w2_ref[...], preferred_element_type=jnp.float32) + b2_ref[...]
    ).astype(jnp.bfloat16)
    h3 = _leaky_relu(
        jnp.dot(h2, wb_ref[...], preferred_element_type=jnp.float32) + bb_ref[...]
    ).astype(jnp.bfloat16)
    out = jnp.dot(h3, wc_ref[...], preferred_element_type=jnp.float32) + bc_ref[...]
    o_ref[...] = out.astype(o_ref.dtype)


# ---------------------------------------------------------------------------
# One-time (offline) parameter fusion / BN folding / padding.
# ---------------------------------------------------------------------------
def prepare_fused_params(params):
    """Fold the module's params into the kernel's matmul form. Call ONCE per
    weight set, outside the jitted forward."""
    (w1, b1, w2, b2, s1, t1, w3, b3, s2, t2, wc, bc) = params
    E = w1.shape[0]

    # Fuse Linear(E,256)->Linear(256,1024) only when it reduces work per row:
    #   fused   : E*1024 MACs,   unfused : E*256 + 256*1024 MACs.
    fuse_first = (E * 1024) <= (E * 256 + 256 * 1024)

    if fuse_first:
        w12 = w1 @ w2                      # (E, 1024), exact (no activation between)
        b12 = b1 @ w2 + b2                 # (1, 1024)
        wa = (w12 * s1).astype(jnp.bfloat16)
        ba = (b12 * s1 + t1).astype(jnp.float32)
        first = (wa, ba)
    else:
        first = (
            w1.astype(jnp.bfloat16), b1.astype(jnp.float32),
            (w2 * s1).astype(jnp.bfloat16), (b2 * s1 + t1).astype(jnp.float32),
        )

    # Fold BN2 affine into Linear(1024, 256).
    wb = (w3 * s2).astype(jnp.bfloat16)
    bb = (b3 * s2 + t2).astype(jnp.float32)

    # Zero-pad classifier to a lane-dense 128-wide output slab.
    wc_pad = jnp.zeros((wc.shape[0], OUT_PAD), jnp.float32).at[:, :2].set(wc)
    bc_pad = jnp.zeros((1, OUT_PAD), jnp.float32).at[:, :2].set(bc)

    weights = first + (wb, bb, wc_pad.astype(jnp.bfloat16), bc_pad.astype(jnp.float32))
    weights = tuple(jax.block_until_ready(w) for w in weights)
    return fuse_first, weights


# ---------------------------------------------------------------------------
# Forward wrapper.
# ---------------------------------------------------------------------------
@functools.partial(jax.jit, static_argnames=("fuse_first", "block_m"))
def _forward_jit(x, weights, *, fuse_first, block_m):
    B, E = x.shape
    bm = _choose_bm(B, block_m)
    Bp = _round_up(B, bm)

    xp = x if Bp == B else jnp.pad(x, ((0, Bp - B), (0, 0)))
    kernel = _fused_kernel if fuse_first else _unfused_kernel

    def rep(a):
        # Replicated (grid-invariant) parameter block: same tile every step,
        # so Pallas only DMAs it once.
        return pl.BlockSpec(a.shape, lambda i: (0, 0))

    in_specs = [pl.BlockSpec((bm, E), lambda i: (i, 0))] + [rep(w) for w in weights]

    # FLOP / byte hints for XLA's scheduler around the custom call.
    if fuse_first:
        macs_per_row = E * 1024 + 1024 * 256 + 256 * OUT_PAD
    else:
        macs_per_row = E * 256 + 256 * 1024 + 1024 * 256 + 256 * OUT_PAD
    weight_bytes = int(sum(w.size * w.dtype.itemsize for w in weights))
    bytes_accessed = int(Bp * E * 4 + weight_bytes + Bp * OUT_PAD * 2)
    cost = pl.CostEstimate(flops=int(2 * Bp * macs_per_row),
                           transcendentals=0,
                           bytes_accessed=bytes_accessed)

    # Raise the scoped-VMEM limit only if needed (v5e default is ~16 MiB).
    est_vmem = 2 * weight_bytes + 2 * (bm * E * 4 + bm * OUT_PAD * 2) + 4 * bm * 1024 * 4
    vmem_limit = None if est_vmem < 12 * 1024 * 1024 else min(2 * est_vmem, 64 * 1024 * 1024)

    out = pl.pallas_call(
        kernel,
        out_shape=jax.ShapeDtypeStruct((Bp, OUT_PAD), jnp.bfloat16),
        grid_spec=pltpu.PrefetchScalarGridSpec(
            num_scalar_prefetch=0,
            grid=(Bp // bm,),
            in_specs=in_specs,
            out_specs=pl.BlockSpec((bm, OUT_PAD), lambda i: (i, 0)),
        ),
        compiler_params=pltpu.CompilerParams(
            dimension_semantics=("parallel",),
            vmem_limit_bytes=vmem_limit,
        ),
        cost_estimate=cost,
    )(xp, *weights)

    # NOTE: padded rows (Bp > B) hold logits of zero rows; slice before any
    # downstream batch-wide op.
    return out[:B, :2].astype(jnp.float32)


def single_text_llm_forward(x, fused_params, *, block_m=512):
    """x: (B, embed_size) float32; fused_params from prepare_fused_params()."""
    fuse_first, weights = fused_params
    return _forward_jit(x, weights, fuse_first=fuse_first, block_m=block_m)


# ---------------------------------------------------------------------------
# Synthetic parameters + pure-JAX f32 reference (unfused) for validation.
# ---------------------------------------------------------------------------
def make_params(key, embed_size):
    ks = jax.random.split(key, 9)

    def lin(kw, kb, fan_in, fan_out):
        # PyTorch Linear weight is (out, in); stored transposed (in, out).
        bound = 1.0 / jnp.sqrt(fan_in)
        w = jax.random.uniform(kw, (fan_in, fan_out), jnp.float32, -bound, bound)
        b = jax.random.uniform(kb, (1, fan_out), jnp.float32, -bound, bound)
        return w, b

    w1, b1 = lin(ks[0], ks[1], embed_size, 256)   # LLM_Linear
    w2, b2 = lin(ks[2], ks[3], 256, 1024)         # MLP Linear 1
    w3, b3 = lin(ks[4], ks[5], 1024, 256)         # MLP Linear 2
    wc, bc = lin(ks[6], ks[7], 256, 2)            # classifierLayer

    def bn(kg, kb_, km, kv, n):                   # BatchNorm1d eval -> scale/shift
        gamma = 1.0 + 0.1 * jax.random.normal(kg, (1, n), jnp.float32)
        beta = 0.1 * jax.random.normal(kb_, (1, n), jnp.float32)
        running_mean = 0.1 * jax.random.normal(km, (1, n), jnp.float32)
        running_var = jnp.abs(1.0 + 0.1 * jax.random.normal(kv, (1, n), jnp.float32))
        scale = gamma / jnp.sqrt(running_var + BN_EPS)
        shift = beta - running_mean * scale
        return scale, shift

    kbn = jax.random.split(ks[8], 8)
    s1, t1 = bn(kbn[0], kbn[1], kbn[2], kbn[3], 1024)
    s2, t2 = bn(kbn[4], kbn[5], kbn[6], kbn[7], 256)

    return (w1, b1, w2, b2, s1, t1, w3, b3, s2, t2, wc, bc)


def reference_forward(x, params):
    (w1, b1, w2, b2, s1, t1, w3, b3, s2, t2, wc, bc) = params
    h1 = x @ w1 + b1
    h2 = _leaky_relu((h1 @ w2 + b2) * s1 + t1)
    h3 = _leaky_relu((h2 @ w3 + b3) * s2 + t2)
    return h3 @ wc + bc


if __name__ == "__main__":
    key = jax.random.PRNGKey(0)
    k1, k2, k3, k4 = jax.random.split(key, 4)

    # Case 1: small embed size -> fused first-two-linears path (3 matmuls).
    B1, E1 = 64, 128
    x1 = jax.random.normal(k1, (B1, E1), dtype=jnp.float32)
    params1 = make_params(k2, E1)
    fused1 = prepare_fused_params(params1)          # one-time, outside the jit
    out1 = jax.block_until_ready(single_text_llm_forward(x1, fused1))
    ref1 = reference_forward(x1, params1)
    assert out1.shape == (B1, 2)
    assert jnp.allclose(out1, ref1, atol=5e-2, rtol=5e-2), "fused path mismatch"

    # Case 2: larger embed size -> unfused path (4 matmuls kept in-kernel).
    B2, E2 = 48, 512
    x2 = jax.random.normal(k3, (B2, E2), dtype=jnp.float32)
    params2 = make_params(k4, E2)
    fused2 = prepare_fused_params(params2)
    out2 = jax.block_until_ready(single_text_llm_forward(x2, fused2))
    ref2 = reference_forward(x2, params2)
    assert out2.shape == (B2, 2)
    assert jnp.allclose(out2, ref2, atol=5e-2, rtol=5e-2), "unfused path mismatch"

    print("KERNEL_OK")
</pallas_src>

<mosaic_0001>
module attributes {stable_mosaic.version = 11 : i64} {
  func.func @_fused_kernel(%arg0: i32, %arg1: memref<32x128xf32, #tpu.memory_space<vmem>>, %arg2: memref<128x1024xbf16, #tpu.memory_space<vmem>>, %arg3: memref<1x1024xf32, #tpu.memory_space<vmem>>, %arg4: memref<1024x256xbf16, #tpu.memory_space<vmem>>, %arg5: memref<1x256xf32, #tpu.memory_space<vmem>>, %arg6: memref<256x128xbf16, #tpu.memory_space<vmem>>, %arg7: memref<1x128xf32, #tpu.memory_space<vmem>>, %arg8: memref<32x128xbf16, #tpu.memory_space<vmem>>) attributes {dimension_semantics = [#tpu.dimension_semantics<parallel>], iteration_bounds = array<i64: 2>, scalar_prefetch = 0 : i64, scratch_operands = 0 : i64, tpu.core_type = #tpu.core_type<tc>, window_params = [{transform_indices = @transform_0, window_bounds = array<i64: 32, 128>}, {pipeline_mode = #tpu.pipeline_mode<synchronous>, transform_indices = @transform_1, window_bounds = array<i64: 128, 1024>}, {pipeline_mode = #tpu.pipeline_mode<synchronous>, transform_indices = @transform_2, window_bounds = array<i64: 1, 1024>}, {pipeline_mode = #tpu.pipeline_mode<synchronous>, transform_indices = @transform_3, window_bounds = array<i64: 1024, 256>}, {pipeline_mode = #tpu.pipeline_mode<synchronous>, transform_indices = @transform_4, window_bounds = array<i64: 1, 256>}, {pipeline_mode = #tpu.pipeline_mode<synchronous>, transform_indices = @transform_5, window_bounds = array<i64: 256, 128>}, {pipeline_mode = #tpu.pipeline_mode<synchronous>, transform_indices = @transform_6, window_bounds = array<i64: 1, 128>}, {transform_indices = @transform_7, window_bounds = array<i64: 32, 128>}]} {
    %c0 = arith.constant 0 : index
    %c0_0 = arith.constant 0 : index
    %0 = vector.load %arg1[%c0, %c0_0] : memref<32x128xf32, #tpu.memory_space<vmem>>, vector<32x128xf32>
    %1 = arith.truncf %0 : vector<32x128xf32> to vector<32x128xbf16>
    %c0_1 = arith.constant 0 : index
    %c0_2 = arith.constant 0 : index
    %2 = vector.load %arg2[%c0_1, %c0_2] : memref<128x1024xbf16, #tpu.memory_space<vmem>>, vector<128x1024xbf16>
    %cst = arith.constant dense<0.000000e+00> : vector<32x1024xf32>
    %3 = tpu.matmul %1, %2, %cst {dimension_numbers = #tpu.dot_dimension_numbers<[1], [0], [0], [1], [0, 0, 1, 1], [], []>} : vector<32x128xbf16>, vector<128x1024xbf16>, vector<32x1024xf32> -> vector<32x1024xf32>
    %c0_3 = arith.constant 0 : index
    %c0_4 = arith.constant 0 : index
    %4 = vector.load %arg3[%c0_3, %c0_4] : memref<1x1024xf32, #tpu.memory_space<vmem>>, vector<1x1024xf32>
    %5 = vector.broadcast %4 : vector<1x1024xf32> to vector<32x1024xf32>
    %6 = arith.addf %3, %5 : vector<32x1024xf32>
    %cst_5 = arith.constant 0.000000e+00 : f32
    %7 = vector.broadcast %cst_5 : f32 to vector<32x1024xf32>
    %8 = arith.cmpf oge, %6, %7 : vector<32x1024xf32>
    %cst_6 = arith.constant 0.00999999977 : f32
    %9 = vector.broadcast %cst_6 : f32 to vector<32x1024xf32>
    %10 = arith.mulf %9, %6 : vector<32x1024xf32>
    %11 = arith.select %8, %6, %10 : vector<32x1024xi1>, vector<32x1024xf32>
    %12 = arith.truncf %11 : vector<32x1024xf32> to vector<32x1024xbf16>
    %c0_7 = arith.constant 0 : index
    %c0_8 = arith.constant 0 : index
    %13 = vector.load %arg4[%c0_7, %c0_8] : memref<1024x256xbf16, #tpu.memory_space<vmem>>, vector<1024x256xbf16>
    %cst_9 = arith.constant dense<0.000000e+00> : vector<32x256xf32>
    %14 = tpu.matmul %12, %13, %cst_9 {dimension_numbers = #tpu.dot_dimension_numbers<[1], [0], [0], [1], [0, 0, 1, 1], [], []>} : vector<32x1024xbf16>, vector<1024x256xbf16>, vector<32x256xf32> -> vector<32x256xf32>
    %c0_10 = arith.constant 0 : index
    %c0_11 = arith.constant 0 : index
    %15 = vector.load %arg5[%c0_10, %c0_11] : memref<1x256xf32, #tpu.memory_space<vmem>>, vector<1x256xf32>
    %16 = vector.broadcast %15 : vector<1x256xf32> to vector<32x256xf32>
    %17 = arith.addf %14, %16 : vector<32x256xf32>
    %cst_12 = arith.constant 0.000000e+00 : f32
    %18 = vector.broadcast %cst_12 : f32 to vector<32x256xf32>
    %19 = arith.cmpf oge, %17, %18 : vector<32x256xf32>
    %cst_13 = arith.constant 0.00999999977 : f32
    %20 = vector.broadcast %cst_13 : f32 to vector<32x256xf32>
    %21 = arith.mulf %20, %17 : vector<32x256xf32>
    %22 = arith.select %19, %17, %21 : vector<32x256xi1>, vector<32x256xf32>
    %23 = arith.truncf %22 : vector<32x256xf32> to vector<32x256xbf16>
    %c0_14 = arith.constant 0 : index
    %c0_15 = arith.constant 0 : index
    %24 = vector.load %arg6[%c0_14, %c0_15] : memref<256x128xbf16, #tpu.memory_space<vmem>>, vector<256x128xbf16>
    %cst_16 = arith.constant dense<0.000000e+00> : vector<32x128xf32>
    %25 = tpu.matmul %23, %24, %cst_16 {dimension_numbers = #tpu.dot_dimension_numbers<[1], [0], [0], [1], [0, 0, 1, 1], [], []>} : vector<32x256xbf16>, vector<256x128xbf16>, vector<32x128xf32> -> vector<32x128xf32>
    %c0_17 = arith.constant 0 : index
    %c0_18 = arith.constant 0 : index
    %26 = vector.load %arg7[%c0_17, %c0_18] : memref<1x128xf32, #tpu.memory_space<vmem>>, vector<1x128xf32>
    %27 = vector.broadcast %26 : vector<1x128xf32> to vector<32x128xf32>
    %28 = arith.addf %25, %27 : vector<32x128xf32>
    %29 = arith.truncf %28 : vector<32x128xf32> to vector<32x128xbf16>
    %c0_19 = arith.constant 0 : index
    %c0_20 = arith.constant 0 : index
    %30 = vector.load %arg8[%c0_19, %c0_20] : memref<32x128xbf16, #tpu.memory_space<vmem>>, vector<32x128xbf16>
    tpu.vector_store %arg8[%c0_19, %c0_20], %29 {strides = array<i32>} : memref<32x128xbf16, #tpu.memory_space<vmem>>, vector<32x128xbf16>,
    return
  }
  func.func @transform_0(%arg0: i32) -> (i32, i32) {
    %c0_i32 = arith.constant 0 : i32
    %c0_i32_0 = arith.constant 0 : i32
    return %arg0, %c0_i32 : i32, i32
  }
  func.func @transform_1(%arg0: i32) -> (i32, i32) {
    %c0_i32 = arith.constant 0 : i32
    %c0_i32_0 = arith.constant 0 : i32
    %c0_i32_1 = arith.constant 0 : i32
    return %c0_i32, %c0_i32_0 : i32, i32
  }
  func.func @transform_2(%arg0: i32) -> (i32, i32) {
    %c0_i32 = arith.constant 0 : i32
    %c0_i32_0 = arith.constant 0 : i32
    %c0_i32_1 = arith.constant 0 : i32
    return %c0_i32, %c0_i32_0 : i32, i32
  }
  func.func @transform_3(%arg0: i32) -> (i32, i32) {
    %c0_i32 = arith.constant 0 : i32
    %c0_i32_0 = arith.constant 0 : i32
    %c0_i32_1 = arith.constant 0 : i32
    return %c0_i32, %c0_i32_0 : i32, i32
  }
  func.func @transform_4(%arg0: i32) -> (i32, i32) {
    %c0_i32 = arith.constant 0 : i32
    %c0_i32_0 = arith.constant 0 : i32
    %c0_i32_1 = arith.constant 0 : i32
    return %c0_i32, %c0_i32_0 : i32, i32
  }
  func.func @transform_5(%arg0: i32) -> (i32, i32) {
    %c0_i32 = arith.constant 0 : i32
    %c0_i32_0 = arith.constant 0 : i32
    %c0_i32_1 = arith.constant 0 : i32
    return %c0_i32, %c0_i32_0 : i32, i32
  }
  func.func @transform_6(%arg0: i32) -> (i32, i32) {
    %c0_i32 = arith.constant 0 : i32
    %c0_i32_0 = arith.constant 0 : i32
    %c0_i32_1 = arith.constant 0 : i32
    return %c0_i32, %c0_i32_0 : i32, i32
  }
  func.func @transform_7(%arg0: i32) -> (i32, i32) {
    %c0_i32 = arith.constant 0 : i32
    %c0_i32_0 = arith.constant 0 : i32
    return %arg0, %c0_i32 : i32, i32
  }
}

</mosaic_0001>

<bundles_post_ra>
// kernel: _forward_jit.1
= control target key start
LH: loop header
LB: loop body
LE: loop exit
PB: predicated region body
PF: predicated region fallthrough
CT: control target
= control target key end

     0   :  { %12 = vsyncpa [#allocation3], 0  ;;  %s3649_s0 = inlined_call_operand.hbm [shape: f32[64,128], index: 0, kind: input, shape index: {}]   ;;  %s3650_s1 = inlined_call_operand.hbm [shape: bf16[128,1024], index: 1, kind: input, shape index: {}]   ;;  %s3651_s2 = inlined_call_operand.hbm [shape: f32[1,1024], index: 2, kind: input, shape index: {}]   ;;  %s3652_s3 = inlined_call_operand.hbm [shape: bf16[1024,256], index: 3, kind: input, shape index: {}]   ;;  %s3653_s4 = inlined_call_operand.vmem [shape: f32[1,256], index: 4, kind: input, shape index: {}]   ;;  %s3654_s5 = inlined_call_operand.hbm [shape: bf16[256,128], index: 5, kind: input, shape index: {}]   ;;  %s3655_s6 = inlined_call_operand.vmem [shape: f32[1,128], index: 6, kind: input, shape index: {}]   ;;  %s3656_s7 = inlined_call_operand.vmem [shape: bf16[64,128], index: 7, kind: output, shape index: {}]  }
   0x1   :  { %14 = vsyncpa [#allocation3 + $0x1], 0 }
   0x2   :  { %15 = vsyncpa [#allocation5], 0 }
   0x3   :  { %16 = vsyncpa [#allocation8], 0  ;;  %s3286_s24 = smov 0   ;;  %s3288_s25 = smov 0  }
   0x4   :  { %s3290_s26 = smov 0   ;;  %s3292_s27 = smov 0  }
   0x5 LB: > { %s2443_s28 = sadd.s32 4294967295, %s3232_s27   ;;  %p42_p0 = scmp.ne.s32.totalorder %s3224_s25, %s3220_s24  ;;  %s3232_s27 = sphi %s3292_s27, %s3673_s27   ;;  %s3228_s26 = sphi %s3290_s26, %s3672_s26   ;;  %s3224_s25 = sphi %s3288_s25, %s3671_s25   ;;  %s3220_s24 = sphi %s3286_s24, %s3670_s24  }
   0x6   : > { %p3308_p1 = scmp.eq.s32.totalorder %s2443_s28, 0  ;;  %p2445_p2 = scmp.ge.s32.totalorder %s3232_s27, 1 }
   0x7   : > { %p205_p3 = scmp.lt.s32.totalorder %s3232_s27, 3  ;;  %s3234_s9 = smov [#allocation4]  }
   0x8   : > { %s3661_s29 = scalar_select %p3308_p1, 1, 0 }
   0x9   : > { %p3316_p4 = por %p3308_p1, %p42_p0  ;;  %p3320_p5 = pnand %p2445_p2, %p205_p3 }
   0xa   : > { %s217_s10 = sshll.u32 %s3234_s9, 4  ;;  %s3235_s12 = smov [#allocation7]   ;;  %s218_s10 = int_to_ptr.vmem [resolvable:$true] %s217_s10 }
   0xb   : > { %s3662_s30 = scalar_select %p3316_p4, 1, 0 }
   0xc   : > { %s3663_s8 = scalar_select %p3320_p5, 1, 0 }
   0xd   : > { %p2771_p6 = pneg %p3320_p5  ;;  %s241_s13 = sshll.u32 %s3235_s12, 4  ;;  %s3332_s13 = int_to_ptr.vmem [resolvable:$true] %s241_s13 }
   0xe   : > { %s3048_s16 = scalar_lea.hbm %s3650_s1, 8192 }
   0xf   : > { %p3328_p7 = pnand %p2771_p6, %p3308_p1  ;;  %p3049_p8 = scmp.ne.s32.totalorder %s3650_s1, %s3048_s16 }
  0x10   : > { %p3055_p12 = scmp.lt.u32.totalorder %s3048_s16, %s3650_s1 }
  0x11   : > { %p3342_p9 = pneg %p3328_p7 }
  0x13   : > { %p3051_p10 = pnand %p3342_p9, %p3049_p8 }
  0x15   : > { %p3052_p11 = pneg %p3051_p10 }
  0x17   : > { %p3057_p13 = pnand %p3055_p12, %p3052_p11 }
  0x19   : > { %3060 = shalt.err (!%p3057_p13)
}
  0x1a   : > { %s3061_s22 = scalar_lea.vmem %s218_s10, 8192  ;;  %p3069_p6 = scmp.lt.s32.totalorder %s218_s10, %s218_s10 }
  0x1b   : > { %p3062_p0 = scmp.ne.s32.totalorder %s218_s10, %s3061_s22  ;;  %p3070_p1 = scmp.lt.s32.totalorder %s3061_s22, %s3061_s22 }
  0x1d   : > { %p3064_p2 = pnand %p3062_p0, %p3342_p9  ;;  %p3071_p4 = por %p3070_p1, %p3069_p6 }
  0x1f   : > { %p3065_p3 = pneg %p3064_p2 }
  0x21   : > { %p3072_p5 = pnand %p3071_p4, %p3065_p3 }
  0x23   : > { %3075 = shalt.err (!%p3072_p5)
}
  0x24   : > { %s3236_s23 = smov 512   ;;  %s3237_s24 = smov 32  }
  0x25   : > { %2774 = dma.hbm_to_vmem [thread:$0]  (!%p3328_p7), %s3650_s1, 8192, %s218_s10, [#allocation5], %s3236_s23, %s3236_s23, %s3237_s24  }
  0x26   : > { %s3076_s16 = scalar_lea.hbm %s3652_s3, 16384 }
  0x27   : > { %p3077_p8 = scmp.ne.s32.totalorder %s3652_s3, %s3076_s16  ;;  %p3083_p5 = scmp.lt.u32.totalorder %s3076_s16, %s3652_s3 }
  0x29   : > { %p3079_p1 = pnand %p3077_p8, %p3342_p9 }
  0x2b   : > { %p3080_p4 = pneg %p3079_p1 }
  0x2d   : > { %p3085_p10 = pnand %p3083_p5, %p3080_p4 }
  0x2f   : > { %3088 = shalt.err (!%p3085_p10)
}
  0x30   : > { %s3089_s10 = scalar_lea.vmem %s3332_s13, 16384  ;;  %p3097_p0 = scmp.lt.s32.totalorder %s3332_s13, %s3332_s13 }
  0x31   : > { %p3090_p11 = scmp.ne.s32.totalorder %s3332_s13, %s3089_s10  ;;  %p3098_p2 = scmp.lt.s32.totalorder %s3089_s10, %s3089_s10 }
  0x33   : > { %p3092_p12 = pnand %p3090_p11, %p3342_p9  ;;  %p3099_p3 = por %p3098_p2, %p3097_p0 }
  0x35   : > { %p3093_p13 = pneg %p3092_p12 }
  0x37   : > { %p3100_p6 = pnand %p3099_p3, %p3093_p13 }
  0x39   : > { %3103 = shalt.err (!%p3100_p6)
}
  0x3a   : > { %s3238_s22 = smov 128   ;;  %s3239_s23 = smov 8  }
  0x3b   : > { %2780 = dma.hbm_to_vmem [thread:$0]  (!%p3328_p7), %s3652_s3, 16384, %s3332_s13, [#allocation8], %s3238_s22, %s3238_s22, %s3239_s23  }
  0x3c   : > { %s3240_s12 = smov [#allocation6]   ;;  %s3241_s15 = smov [#allocation9]  }
  0x3d   : > { %s231_s14 = sshll.u32 %s3240_s12, 4  ;;  %s257_s16 = sshll.u32 %s3241_s15, 4  ;;  %s232_s14 = int_to_ptr.vmem [resolvable:$true] %s231_s14  ;;  %s3384_s16 = int_to_ptr.vmem [resolvable:$true] %s257_s16 }
  0x3e   : > { %s3104_s20 = scalar_lea.hbm %s3651_s2, 128 }
  0x3f   : > { %p3105_p8 = scmp.ne.s32.totalorder %s3651_s2, %s3104_s20  ;;  %p3111_p5 = scmp.lt.u32.totalorder %s3104_s20, %s3651_s2 }
  0x41   : > { %p3107_p1 = pnand %p3105_p8, %p3342_p9 }
  0x43   : > { %p3108_p4 = pneg %p3107_p1 }
  0x45   : > { %p3113_p10 = pnand %p3111_p5, %p3108_p4 }
  0x47   : > { %3116 = shalt.err (!%p3113_p10)
}
  0x48   : > { %s3117_s9 = scalar_lea.vmem %s232_s14, 128  ;;  %p3125_p0 = scmp.lt.s32.totalorder %s232_s14, %s232_s14 }
  0x49   : > { %p3118_p11 = scmp.ne.s32.totalorder %s232_s14, %s3117_s9  ;;  %p3126_p2 = scmp.lt.s32.totalorder %s3117_s9, %s3117_s9 }
  0x4b   : > { %p3120_p12 = pnand %p3118_p11, %p3342_p9  ;;  %p3127_p3 = por %p3126_p2, %p3125_p0 }
  0x4d   : > { %p3121_p13 = pneg %p3120_p12 }
  0x4f   : > { %p3128_p6 = pnand %p3127_p3, %p3121_p13 }
  0x51   : > { %3131 = shalt.err (!%p3128_p6)
}
  0x52   : > { %2777 = dma.hbm_to_vmem [thread:$0]  (!%p3328_p7), %s3651_s2, 128, %s232_s14, [#allocation5]  }
  0x53   : > { %s3132_s20 = scalar_lea.hbm %s3654_s5, 2048 }
  0x54   : > { %p3133_p8 = scmp.ne.s32.totalorder %s3654_s5, %s3132_s20  ;;  %p3139_p5 = scmp.lt.u32.totalorder %s3132_s20, %s3654_s5 }
  0x56   : > { %p3135_p1 = pnand %p3133_p8, %p3342_p9 }
  0x58   : > { %p3136_p4 = pneg %p3135_p1 }
  0x5a   : > { %p3141_p10 = pnand %p3139_p5, %p3136_p4 }
  0x5c   : > { %3144 = shalt.err (!%p3141_p10)
}
  0x5d   : > { %s3145_s14 = scalar_lea.vmem %s3384_s16, 2048  ;;  %p3153_p0 = scmp.lt.s32.totalorder %s3384_s16, %s3384_s16 }
  0x5e   : > { %p3146_p11 = scmp.ne.s32.totalorder %s3384_s16, %s3145_s14  ;;  %p3154_p2 = scmp.lt.s32.totalorder %s3145_s14, %s3145_s14 }
  0x60   : > { %p3148_p12 = pnand %p3146_p11, %p3342_p9  ;;  %p3155_p3 = por %p3154_p2, %p3153_p0 }
  0x62   : > { %p3149_p13 = pneg %p3148_p12 }
  0x64   : > { %p3156_p6 = pnand %p3155_p3, %p3149_p13 }
  0x66   : > { %3159 = shalt.err (!%p3156_p6)
}
  0x67   : > { %s3242_s9 = smov 64   ;;  %s3243_s19 = smov 4  }
  0x68   : > { %2783 = dma.hbm_to_vmem [thread:$0]  (!%p3328_p7), %s3654_s5, 2048, %s3384_s16, [#allocation8], %s3242_s9, %s3242_s9, %s3243_s19  }
  0x69   : > { %s3428_s17 = sadd.s32 1, %s3232_s27   ;;  %s29_s20 = sadd.s32 1, %s3228_s26 }
  0x6a   : > { %s26_s18 = ssub.s32 %s3232_s27, %s3428_s17  ;;  %p36_p8 = scmp.ne.s32.totalorder %s3228_s26, %s3224_s25 }
  0x6b   : > { %p27_p9 = scmp.eq.s32.totalorder %s26_s18, 0  ;;  %p37_p1 = scmp.eq.s32.totalorder %s3232_s27, 0 }
  0x6c   : > { %p2792_p5 = scmp.lt.s32.totalorder %s3232_s27, 2  ;;  %s274_s10 = sand.u32 1, %s3228_s26  }
  0x6d   : > { %s3437_s21 = scalar_select %p27_p9, %s3228_s26, %s29_s20  }
  0x6e   : > { %p38_p4 = por %p37_p1, %p36_p8  ;;  %s2677_s24 = sshll.u32 %s3232_s27, 9 }
  0x6f   : > { %s2451_s13 = sshll.u32 %s274_s10, 5  ;;  %s3445_s12 = scalar_lea.hbm %s3649_s0, %s2677_s24 }
  0x70   : > { %s278_s16 = scalar_lea.vmem [#allocation2], %s2451_s13  ;;  %p3447_p7 = pnand %p2792_p5, %p38_p4 }
  0x71   : > { %s285_s9 = sshll.u32 %s278_s16, 4  ;;  %s3453_s15 = scalar_lea.sflag [#allocation3], %s274_s10  ;;  %s3451_s9 = int_to_ptr.vmem [resolvable:$true] %s285_s9 }
  0x72   : > { %s3160_s18 = scalar_lea.hbm %s3445_s12, 512  ;;  %p3162_p11 = pneg %p3447_p7 }
  0x73   : > { %p3161_p10 = scmp.ne.s32.totalorder %s3445_s12, %s3160_s18  ;;  %s3165_s13 = scalar_lea.hbm %s3649_s0, 1024 }
  0x74   : > { %p3166_p0 = scmp.lt.u32.totalorder %s3445_s12, %s3649_s0  ;;  %p3167_p2 = scmp.lt.u32.totalorder %s3165_s13, %s3160_s18 }
  0x75   : > { %p3163_p12 = pnand %p3162_p11, %p3161_p10  ;;  %p3169_p6 = scmp.lt.u32.totalorder %s3160_s18, %s3445_s12 }
  0x76   : > { %p3168_p3 = por %p3167_p2, %p3166_p0 }
  0x77   : > { %p3164_p13 = pneg %p3163_p12 }
  0x78   : > { %p3170_p9 = por %p3169_p6, %p3168_p3 }
  0x7a   : > { %p3171_p8 = pnand %p3170_p9, %p3164_p13 }
  0x7c   : > { %3174 = shalt.err (!%p3171_p8)
}
  0x7d   : > { %s3175_s10 = scalar_lea.vmem %s3451_s9, 512  ;;  %s3244_s16 = smov [#allocation2]  }
  0x7e   : > { %p3176_p1 = scmp.ne.s32.totalorder %s3451_s9, %s3175_s10  ;;  %s3180_s20 = sshll.u32 %s3244_s16, 4  ;;  %s3181_s20 = int_to_ptr.vmem [resolvable:$false] %s3180_s20 }
  0x7f   : > { %s3182_s24 = scalar_lea.vmem %s3181_s20, 1024  ;;  %p3183_p10 = scmp.lt.s32.totalorder %s3451_s9, %s3181_s20 }
  0x80   : > { %p3178_p4 = pnand %p3176_p1, %p3162_p11  ;;  %p3184_p12 = scmp.lt.s32.totalorder %s3182_s24, %s3175_s10 }
  0x82   : > { %p3179_p5 = pneg %p3178_p4  ;;  %p3185_p0 = por %p3184_p12, %p3183_p10 }
  0x84   : > { %p3186_p2 = pnand %p3185_p0, %p3179_p5 }
  0x86   : > { %3189 = shalt.err (!%p3186_p2)
}
  0x87   : > { %2787 = dma.hbm_to_vmem [thread:$0]  (!%p3447_p7), %s3445_s12, 512, %s3451_s9, %s3453_s15, %s3238_s22, %s3238_s22, %s3239_s23  }
  0x88   : > { %p3667_p11 = scmp.ne.s32.totalorder %s3663_s8, 0 }
  0x89   : > { %s299_s18 = sand.u32 (!%p3667_p11), 1, %s3224_s25   ;;  %p3668_p13 = scmp.ne.s32.totalorder (!%p3667_p11), %s3662_s30, 0 }
  0x8a   : > { %297 = sbr.rel (%p3667_p11) target bundleno = 1023 (0x3ff), region = 48  ;;  %s2455_s13 = sshll.u32 (!%p3667_p11), %s299_s18, 5 }
  0x8b   : > { %s300_s11 = scalar_lea.sflag (!%p3667_p11), [#allocation3], %s299_s18  ;;  %s3487_s14 = scalar_lea.vmem (!%p3667_p11), [#allocation2], %s2455_s13 }
  0x91   : > { %3207 = dma.done.wait (%p3668_p13), %s300_s11, 512  }
  0x92   : > { %3209 = vsyncadd (%p3668_p13), %s300_s11, 4294966784  ;;  %p3669_p3 = scmp.ne.s32.totalorder %s3661_s29, 0 }
  0x94   : > { %3211 = dma.done.wait (%p3669_p3), [#allocation5], 8320  }
  0x95   : > { %3213 = vsyncadd (%p3669_p3), [#allocation5], 4294958976 }
  0x96   : > { %3215 = dma.done.wait (%p3669_p3), [#allocation8], 18432  }
  0x97   : > { %3217 = vsyncadd (%p3669_p3), [#allocation8], 4294948864  ;;  %v3245_v0 = vmov 0   ;;  %v364_v1 = vld [vmem:[#allocation4] sm:$0xff]  ;;  %v366_v19 = vld [vmem:[#allocation4 + $0x10] sm:$0xff]  ;;  %s2460_s8 = sshll.u32 %s2443_s28, 2 }
  0x98   : > { %822 = vmatprep.mubr.bf16.mxu1 %v3245_v0  ;;  %928 = vmatprep.mubr.bf16.mxu0 %v3245_v0  ;;  %v368_v2 = vld [vmem:[#allocation4 + $0x20] sm:$0xff]  ;;  %v370_v20 = vld [vmem:[#allocation4 + $0x30] sm:$0xff]  ;;  %v365_v48 = vld [vmem:[#allocation4 + $0x8] sm:$0xff]  ;;  %p352_p7 = scmp.lt.s32.totalorder %s2460_s8, 7 }
  0x99   : > { %v372_v3 = vld [vmem:[#allocation4 + $0x40] sm:$0xff]  ;;  %v2463_v4 = vcombine.high %v364_v1, %v368_v2  ;;  %v2462_v5 = vcombine.low %v364_v1, %v368_v2  ;;  %v374_v21 = vld [vmem:[#allocation4 + $0x50] sm:$0xff]  ;;  %v2467_v24 = vcombine.high %v366_v19, %v370_v20  ;;  %v2466_v25 = vcombine.low %v366_v19, %v370_v20  ;;  %v369_v51 = vld [vmem:[#allocation4 + $0x28] sm:$0xff] }
  0x9a   : > { %v376_v6 = vld [vmem:[#allocation4 + $0x60] sm:$0xff]  ;;  %v378_v26 = vld [vmem:[#allocation4 + $0x70] sm:$0xff]  ;;  %v359_v57 = vld [vmem:[%s3487_s14 + $0x8] sm:$0xff]  ;;  %v2465_v59 = vcombine.high %v365_v48, %v369_v51  ;;  %s3675_s8 = smov (!%p352_p7, %s2460_s8), 7 }
  0x9b   : > { %v2471_v7 = vcombine.high %v372_v3, %v376_v6  ;;  %v380_v8 = vld [vmem:[#allocation4 + $0x80] sm:$0xff]  ;;  %790 = vmatprep.subr.bf16.mxu1 %v2463_v4  ;;  %v2470_v10 = vcombine.low %v372_v3, %v376_v6  ;;  %v2475_v28 = vcombine.high %v374_v21, %v378_v26  ;;  %v382_v29 = vld [vmem:[#allocation4 + $0x90] sm:$0xff]  ;;  %896 = vmatprep.subr.bf16.mxu0 %v2467_v24  ;;  %v373_v61 = vld [vmem:[#allocation4 + $0x48] sm:$0xff]  ;;  %s2461_s12 = sshll.u32 %s3675_s8, 2 }
  0x9c   : > { %v384_v9 = vld [vmem:[#allocation4 + $0xa0] sm:$0xff]  ;;  %791 = vmatpush1.bf16.msra.mxu1 %v2462_v5  ;;  %v386_v30 = vld [vmem:[#allocation4 + $0xb0] sm:$0xff]  ;;  %897 = vmatpush1.bf16.msra.mxu0 %v2466_v25  ;;  %v2474_v32 = vcombine.low %v374_v21, %v378_v26  ;;  %v377_v62 = vld [vmem:[#allocation4 + $0x68] sm:$0xff]  ;;  %v2464_v3 = vcombine.low %v365_v48, %v369_v51  ;;  %s355_s27 = scalar_lea.vmem %s3656_s7, %s2461_s12 }
  0x9d   : > { %792 = vmatprep.subr.bf16.mxu1 %v2471_v7  ;;  %v2479_v11 = vcombine.high %v380_v8, %v384_v9  ;;  %v388_v12 = vld [vmem:[#allocation4 + $0xc0] sm:$0xff]  ;;  %v2478_v14 = vcombine.low %v380_v8, %v384_v9  ;;  %898 = vmatprep.subr.bf16.mxu0 %v2475_v28  ;;  %v2483_v35 = vcombine.high %v382_v29, %v386_v30  ;;  %v390_v37 = vld [vmem:[#allocation4 + $0xd0] sm:$0xff]  ;;  %v381_v5 = vld [vmem:[#allocation4 + $0x88] sm:$0xff] }
  0x9e   : > { %v392_v13 = vld [vmem:[#allocation4 + $0xe0] sm:$0xff]  ;;  %v394_v38 = vld [vmem:[#allocation4 + $0xf0] sm:$0xff]  ;;  %v2482_v40 = vcombine.low %v382_v29, %v386_v30  ;;  %v2473_v4 = vcombine.high %v373_v61, %v377_v62  ;;  %v385_v7 = vld [vmem:[#allocation4 + $0xa8] sm:$0xff] }
  0x9f   : > { %v2487_v15 = vcombine.high %v388_v12, %v392_v13  ;;  %v396_v16 = vld [vmem:[#allocation4 + $0x100] sm:$0xff]  ;;  %v2486_v18 = vcombine.low %v388_v12, %v392_v13  ;;  %v2491_v44 = vcombine.high %v390_v37, %v394_v38  ;;  %v398_v45 = vld [vmem:[#allocation4 + $0x110] sm:$0xff]  ;;  %v2490_v49 = vcombine.low %v390_v37, %v394_v38  ;;  %v361_v13 = vld [vmem:[%s3487_s14 + $0x18] sm:$0xff] }
  0xa0   : > { %793 = vmatpush1.bf16.msra.mxu1 %v2470_v10  ;;  %v400_v17 = vld [vmem:[#allocation4 + $0x120] sm:$0xff]  ;;  %899 = vmatpush1.bf16.msra.mxu0 %v2474_v32  ;;  %v402_v46 = vld [vmem:[#allocation4 + $0x130] sm:$0xff]  ;;  %v2472_v12 = vcombine.low %v373_v61, %v377_v62  ;;  %v2480_v20 = vcombine.low %v381_v5, %v385_v7  ;;  %v401_v24 = vld [vmem:[#allocation4 + $0x128] sm:$0xff] }
  0xa1   : > { %794 = vmatprep.subr.bf16.mxu1 %v2479_v11  ;;  %v2495_v22 = vcombine.high %v396_v16, %v400_v17  ;;  %v404_v23 = vld [vmem:[#allocation4 + $0x140] sm:$0xff]  ;;  %v2494_v31 = vcombine.low %v396_v16, %v400_v17  ;;  %900 = vmatprep.subr.bf16.mxu0 %v2483_v35  ;;  %v2499_v52 = vcombine.high %v398_v45, %v402_v46  ;;  %v406_v53 = vld [vmem:[#allocation4 + $0x150] sm:$0xff]  ;;  %v389_v16 = vld [vmem:[#allocation4 + $0xc8] sm:$0xff] }
  0xa2   : > { %v408_v27 = vld [vmem:[#allocation4 + $0x160] sm:$0xff]  ;;  %v410_v54 = vld [vmem:[#allocation4 + $0x170] sm:$0xff]  ;;  %v2498_v58 = vcombine.low %v398_v45, %v402_v46  ;;  %v393_v17 = vld [vmem:[#allocation4 + $0xe8] sm:$0xff] }
  0xa3   : > { %v2503_v33 = vcombine.high %v404_v23, %v408_v27  ;;  %v412_v34 = vld [vmem:[#allocation4 + $0x180] sm:$0xff]  ;;  %v2502_v39 = vcombine.low %v404_v23, %v408_v27  ;;  %v2507_v60 = vcombine.high %v406_v53, %v410_v54  ;;  %v414_v1 = vld [vmem:[#allocation4 + $0x190] sm:$0xff]  ;;  %v2506_v6 = vcombine.low %v406_v53, %v410_v54  ;;  %v405_v28 = vld [vmem:[#allocation4 + $0x148] sm:$0xff] }
  0xa4   : > { %795 = vmatpush1.bf16.msra.mxu1 %v2478_v14  ;;  %v416_v36 = vld [vmem:[#allocation4 + $0x1a0] sm:$0xff]  ;;  %901 = vmatpush1.bf16.msra.mxu0 %v2482_v40  ;;  %v418_v2 = vld [vmem:[#allocation4 + $0x1b0] sm:$0xff]  ;;  %v2481_v14 = vcombine.high %v381_v5, %v385_v7  ;;  %v2489_v21 = vcombine.high %v389_v16, %v393_v17  ;;  %v2488_v26 = vcombine.low %v389_v16, %v393_v17  ;;  %v409_v29 = vld [vmem:[#allocation4 + $0x168] sm:$0xff] }
  0xa5   : > { %796 = vmatprep.subr.bf16.mxu1 %v2487_v15  ;;  %v2511_v41 = vcombine.high %v412_v34, %v416_v36  ;;  %v420_v42 = vld [vmem:[#allocation4 + $0x1c0] sm:$0xff]  ;;  %v2510_v47 = vcombine.low %v412_v34, %v416_v36  ;;  %902 = vmatprep.subr.bf16.mxu0 %v2491_v44  ;;  %v360_v8 = vld [vmem:[%s3487_s14 + $0x10] sm:$0xff]  ;;  %v2515_v9 = vcombine.high %v414_v1, %v418_v2  ;;  %v417_v34 = vld [vmem:[#allocation4 + $0x1a8] sm:$0xff] }
  0xa6   : > { %v424_v43 = vld [vmem:[#allocation4 + $0x1e0] sm:$0xff]  ;;  %v422_v10 = vld [vmem:[#allocation4 + $0x1d0] sm:$0xff]  ;;  %v2514_v15 = vcombine.low %v414_v1, %v418_v2  ;;  %v3511_v19 = vpack.c.bf16 %v361_v13, %v360_v8  ;;  %v2505_v36 = vcombine.high %v405_v28, %v409_v29  ;;  %v2504_v38 = vcombine.low %v405_v28, %v409_v29  ;;  %v425_v40 = vld [vmem:[#allocation4 + $0x1e8] sm:$0xff] }
  0xa7   : > { %v2519_v50 = vcombine.high %v420_v42, %v424_v43  ;;  %v358_v55 = vld [vmem:[%s3487_s14] sm:$0xff]  ;;  %v2518_v56 = vcombine.low %v420_v42, %v424_v43  ;;  %v426_v11 = vld [vmem:[#allocation4 + $0x1f0] sm:$0xff]  ;;  %v367_v45 = vld [vmem:[#allocation4 + $0x18] sm:$0xff] }
  0xa8   : > { %797 = vmatpush1.bf16.msra.mxu1 %v2486_v18  ;;  %903 = vmatpush1.bf16.msra.mxu0 %v2490_v49  ;;  %v3505_v63 = vpack.c.bf16 %v359_v57, %v358_v55  ;;  %v2523_v18 = vcombine.high %v422_v10, %v426_v11  ;;  %v2522_v23 = vcombine.low %v422_v10, %v426_v11  ;;  %v2866_v25 = vld [vmem:[#allocation7 + $0x104] ss:$8 sps:$4 sm:$0xff]   ;;  %v2864_v30 = vld [vmem:[#allocation7 + $0x100] ss:$8 sps:$4 sm:$0xff]   ;;  %v2870_v35 = vld [vmem:[#allocation7 + $0x110] ss:$8 sps:$4 sm:$0xff]  }
  0xa9   : > { %798 = vmatprep.subr.bf16.mxu1 %v2495_v22  ;;  %904 = vmatprep.subr.bf16.mxu0 %v2499_v52  ;;  %v397_v22 = vld [vmem:[#allocation4 + $0x108] sm:$0xff]  ;;  %v2884_v43 = vld [vmem:[#allocation7 + $0x134] ss:$8 sps:$4 sm:$0xff]  }
  0xaa   : > { %v2497_v27 = vcombine.high %v397_v22, %v401_v24  ;;  %v2496_v32 = vcombine.low %v397_v22, %v401_v24  ;;  %v2878_v37 = vld [vmem:[#allocation7 + $0x124] ss:$8 sps:$4 sm:$0xff]   ;;  %v371_v46 = vld [vmem:[#allocation4 + $0x38] sm:$0xff]  ;;  %v2888_v53 = vld [vmem:[#allocation7 + $0x140] ss:$8 sps:$4 sm:$0xff]  }
  0xab   : > { %v2890_v49 = vld [vmem:[#allocation7 + $0x144] ss:$8 sps:$4 sm:$0xff]   ;;  %v375_v51 = vld [vmem:[#allocation4 + $0x58] sm:$0xff]  ;;  %v2469_v54 = vcombine.high %v367_v45, %v371_v46  ;;  %v2840_v24 = vld [vmem:[#allocation7] ss:$8 sps:$4 sm:$0xff]  }
  0xac   : > { %799 = vmatpush1.bf16.msra.mxu1 %v2494_v31  ;;  %905 = vmatpush1.bf16.msra.mxu0 %v2498_v58  ;;  %v2872_v31 = vld [vmem:[#allocation7 + $0x114] ss:$8 sps:$4 sm:$0xff]   ;;  %v2846_v28 = vld [vmem:[#allocation7 + $0x20] ss:$8 sps:$4 sm:$0xff]  }
  0xad   : > { %800 = vmatprep.subr.bf16.mxu1 %v2503_v33  ;;  %906 = vmatprep.subr.bf16.mxu0 %v2507_v60  ;;  %v413_v33 = vld [vmem:[#allocation4 + $0x188] sm:$0xff]  ;;  %v379_v52 = vld [vmem:[#allocation4 + $0x78] sm:$0xff] }
  0xae   : > { %v2513_v42 = vcombine.high %v413_v33, %v417_v34  ;;  %v2512_v44 = vcombine.low %v413_v33, %v417_v34  ;;  %v2896_v55 = vld [vmem:[#allocation7 + $0x154] ss:$8 sps:$4 sm:$0xff]   ;;  %v2477_v60 = vcombine.high %v375_v51, %v379_v52  ;;  %v2476_v61 = vcombine.low %v375_v51, %v379_v52  ;;  %v2855_v33 = vld [vmem:[#allocation7 + $0x50] ss:$8 sps:$4 sm:$0xff]   ;;  %v2902_v34 = vld [vmem:[#allocation7 + $0x164] ss:$8 sps:$4 sm:$0xff]  }
  0xaf   : > { %v383_v57 = vld [vmem:[#allocation4 + $0x98] sm:$0xff]  ;;  %v2879_v52 = vld [vmem:[#allocation7 + $0xa0] ss:$8 sps:$4 sm:$0xff]  }
  0xb0   : > { %801 = vmatpush1.bf16.msra.mxu1 %v2502_v39  ;;  %907 = vmatpush1.bf16.msra.mxu0 %v2506_v6  ;;  %v421_v39 = vld [vmem:[#allocation4 + $0x1c8] sm:$0xff]  ;;  %v387_v58 = vld [vmem:[#allocation4 + $0xb8] sm:$0xff] }
  0xb1   : > { %802 = vmatprep.subr.bf16.mxu1 %v2511_v41  ;;  %908 = vmatprep.subr.bf16.mxu0 %v2515_v9  ;;  %v2876_v41 = vld [vmem:[#allocation7 + $0x120] ss:$8 sps:$4 sm:$0xff]   ;;  %v2521_v48 = vcombine.high %v421_v39, %v425_v40  ;;  %v391_v62 = vld [vmem:[#allocation4 + $0xd8] sm:$0xff]  ;;  %v2485_v2 = vcombine.high %v383_v57, %v387_v58 }
  0xb2   : > { %v395_v1 = vld [vmem:[#allocation4 + $0xf8] sm:$0xff] }
  0xb3   : > { %v403_v5 = vld [vmem:[#allocation4 + $0x138] sm:$0xff]  ;;  %v2493_v6 = vcombine.high %v391_v62, %v395_v1  ;;  %v2492_v7 = vcombine.low %v391_v62, %v395_v1 }
  0xb4   : > { %803 = vmatpush1.bf16.msra.mxu1 %v2510_v47  ;;  %909 = vmatpush1.bf16.msra.mxu0 %v2514_v15  ;;  %v2882_v47 = vld [vmem:[#allocation7 + $0x130] ss:$8 sps:$4 sm:$0xff]   ;;  %v2851_v29 = vld [vmem:[#allocation7 + $0x34] ss:$8 sps:$4 sm:$0xff]  }
  0xb5   : > { %804 = vmatprep.subr.bf16.mxu1 %v2519_v50  ;;  %910 = vmatprep.subr.bf16.mxu0 %v2523_v18  ;;  %v2520_v50 = vcombine.low %v421_v39, %v425_v40  ;;  %v407_v8 = vld [vmem:[#allocation4 + $0x158] sm:$0xff]  ;;  %v2869_v40 = vld [vmem:[#allocation7 + $0x84] ss:$8 sps:$4 sm:$0xff]  }
  0xb6   : > { %v411_v9 = vld [vmem:[#allocation4 + $0x178] sm:$0xff] }
  0xb7   : > { %v419_v13 = vld [vmem:[#allocation4 + $0x1b8] sm:$0xff]  ;;  %v2508_v15 = vcombine.low %v407_v8, %v411_v9 }
  0xb8   : > { %805 = vmatpush1.bf16.msra.mxu1 %v2518_v56  ;;  %911 = vmatpush1.bf16.msra.mxu0 %v2522_v23  ;;  %v2468_v56 = vcombine.low %v367_v45, %v371_v46  ;;  %v423_v16 = vld [vmem:[#allocation4 + $0x1d8] sm:$0xff]  ;;  %v2842_v23 = vld [vmem:[#allocation7 + $0x4] ss:$8 sps:$4 sm:$0xff]  }
  0xb9   : > { %843 = vmatprep.subr.bf16.mxu1 %v2465_v59  ;;  %1947 = vmatprep.subr.bf16.mxu0 %v2866_v25  ;;  %v2894_v59 = vld [vmem:[#allocation7 + $0x150] ss:$8 sps:$4 sm:$0xff]   ;;  %v2845_v25 = vld [vmem:[#allocation7 + $0x14] ss:$8 sps:$4 sm:$0xff]  }
  0xba   : > { %v427_v17 = vld [vmem:[#allocation4 + $0x1f8] sm:$0xff] }
  0xbb   : > { %823 = vmatmul.mubr.bf16.vlgmr.msra.gmra.mrb[0].mxu1 %v3505_v63  ;;  %929 = vmatmul.mubr.bf16.vlgmr.msra.gmra.mrb[0].mxu0 %v3505_v63  ;;  %v2524_v22 = vcombine.low %v423_v16, %v427_v17  ;;  %v2906_v39 = vld [vmem:[#allocation7 + $0x170] ss:$8 sps:$4 sm:$0xff]   ;;  %v2917_v46 = vld [vmem:[#allocation7 + $0x194] ss:$8 sps:$4 sm:$0xff]  }
  0xbc   : > { %844 = vmatpush1.bf16.msra.mxu1 %v2464_v3  ;;  %832 = vmatprep.mubr.bf16.mxu1 %v3245_v0  ;;  %v2484_v3 = vcombine.low %v383_v57, %v387_v58  ;;  %v2915_v45 = vld [vmem:[#allocation7 + $0x190] ss:$8 sps:$4 sm:$0xff]   ;;  %v2923_v51 = vld [vmem:[#allocation7 + $0x1b4] ss:$8 sps:$4 sm:$0xff]   ;;  %v2893_v57 = vld [vmem:[#allocation7 + $0xc4] ss:$8 sps:$4 sm:$0xff]  }
  0xbd   : > { %845 = vmatprep.subr.bf16.mxu1 %v2473_v4  ;;  %938 = vmatprep.mubr.bf16.mxu0 %v3245_v0  ;;  %v399_v4 = vld [vmem:[#allocation4 + $0x118] sm:$0xff]  ;;  %v2924_v58 = vld [vmem:[#allocation7 + $0x1c0] ss:$8 sps:$4 sm:$0xff]  }
  0xbe   : > { %1948 = vmatpush1.bf16.msra.mxu0 %v2864_v30  ;;  %v2501_v10 = vcombine.high %v399_v4, %v403_v5  ;;  %v2500_v11 = vcombine.low %v399_v4, %v403_v5  ;;  %v2849_v30 = vld [vmem:[#allocation7 + $0x30] ss:$8 sps:$4 sm:$0xff]   ;;  %v2903_v4 = vld [vmem:[#allocation7 + $0xe0] ss:$8 sps:$4 sm:$0xff]  }
  0xbf   : > { %1949 = vmatprep.subr.bf16.mxu0 %v2872_v31  ;;  %v2854_v31 = vld [vmem:[#allocation7 + $0x44] ss:$8 sps:$4 sm:$0xff]   ;;  %v2927_v62 = vld [vmem:[#allocation7 + $0x1d0] ss:$8 sps:$4 sm:$0xff]   ;;  %v2930_v5 = vld [vmem:[#allocation7 + $0x1e0] ss:$8 sps:$4 sm:$0xff]  }
  0xc0   : > { %846 = vmatpush1.bf16.msra.mxu1 %v2472_v12  ;;  %v415_v12 = vld [vmem:[#allocation4 + $0x198] sm:$0xff] }
  0xc1   : > { %847 = vmatprep.subr.bf16.mxu1 %v2481_v14  ;;  %v2509_v14 = vcombine.high %v407_v8, %v411_v9  ;;  %v2517_v18 = vcombine.high %v415_v12, %v419_v13  ;;  %v2897_v1 = vld [vmem:[#allocation7 + $0xd0] ss:$8 sps:$4 sm:$0xff]  }
  0xc2   : > { %1950 = vmatpush1.bf16.msra.mxu0 %v2870_v35  ;;  %v2858_v35 = vld [vmem:[#allocation7 + $0x60] ss:$8 sps:$4 sm:$0xff]   ;;  %v2909_v8 = vld [vmem:[#allocation7 + $0xf0] ss:$8 sps:$4 sm:$0xff]  }
  0xc3   : > { %833 = vmatmul.mubr.bf16.gmra.mrb[4].mxu1 %v3511_v19  ;;  %1951 = vmatprep.subr.bf16.mxu0 %v2878_v37  ;;  %v2863_v37 = vld [vmem:[#allocation7 + $0x74] ss:$8 sps:$4 sm:$0xff]   ;;  %v2933_v9 = vld [vmem:[#allocation7 + $0x1f0] ss:$8 sps:$4 sm:$0xff]  }
  0xc4   : > { %848 = vmatpush1.bf16.msra.mxu1 %v2480_v20  ;;  %875 = vmatprep.mubr.bf16.mxu1 %v3245_v0  ;;  %v2516_v20 = vcombine.low %v415_v12, %v419_v13 }
  0xc5   : > { %849 = vmatprep.subr.bf16.mxu1 %v2489_v21  ;;  %939 = vmatmul.mubr.bf16.gmra.mrb[4].mxu0 %v3511_v19  ;;  %v2525_v21 = vcombine.high %v423_v16, %v427_v17 }
  0xc6   : > { %1952 = vmatpush1.bf16.msra.mxu0 %v2876_v41  ;;  %v2914_v41 = vld [vmem:[#allocation7 + $0x184] ss:$8 sps:$4 sm:$0xff]  }
  0xc7   : > { %1953 = vmatprep.subr.bf16.mxu0 %v2884_v43  ;;  %v2912_v43 = vld [vmem:[#allocation7 + $0x180] ss:$8 sps:$4 sm:$0xff]  }
  0xc8   : > { %850 = vmatpush1.bf16.msra.mxu1 %v2488_v26  ;;  %v2843_v26 = vld [vmem:[#allocation7 + $0x10] ss:$8 sps:$4 sm:$0xff]  }
  0xc9   : > { %851 = vmatprep.subr.bf16.mxu1 %v2497_v27  ;;  %v2848_v27 = vld [vmem:[#allocation7 + $0x24] ss:$8 sps:$4 sm:$0xff]  }
  0xca   : > { %1954 = vmatpush1.bf16.msra.mxu0 %v2882_v47  ;;  %v2873_v47 = vld [vmem:[#allocation7 + $0x90] ss:$8 sps:$4 sm:$0xff]  }
  0xcb   : > { %1955 = vmatprep.subr.bf16.mxu0 %v2890_v49  ;;  %v2881_v49 = vld [vmem:[#allocation7 + $0xa4] ss:$8 sps:$4 sm:$0xff]  }
  0xcc   : > { %852 = vmatpush1.bf16.msra.mxu1 %v2496_v32  ;;  %v2852_v32 = vld [vmem:[#allocation7 + $0x40] ss:$8 sps:$4 sm:$0xff]  }
  0xcd   : > { %853 = vmatprep.subr.bf16.mxu1 %v2505_v36  ;;  %v2900_v36 = vld [vmem:[#allocation7 + $0x160] ss:$8 sps:$4 sm:$0xff]  }
  0xce   : > { %1956 = vmatpush1.bf16.msra.mxu0 %v2888_v53  ;;  %v2887_v53 = vld [vmem:[#allocation7 + $0xb4] ss:$8 sps:$4 sm:$0xff]  }
  0xcf   : > { %1957 = vmatprep.subr.bf16.mxu0 %v2896_v55  ;;  %v2926_v55 = vld [vmem:[#allocation7 + $0x1c4] ss:$8 sps:$4 sm:$0xff]  }
  0xd0   : > { %854 = vmatpush1.bf16.msra.mxu1 %v2504_v38  ;;  %v2861_v38 = vld [vmem:[#allocation7 + $0x70] ss:$8 sps:$4 sm:$0xff]  }
  0xd1   : > { %855 = vmatprep.subr.bf16.mxu1 %v2513_v42  ;;  %v2867_v42 = vld [vmem:[#allocation7 + $0x80] ss:$8 sps:$4 sm:$0xff]  }
  0xd2   : > { %1958 = vmatpush1.bf16.msra.mxu0 %v2894_v59  ;;  %v2929_v59 = vld [vmem:[#allocation7 + $0x1d4] ss:$8 sps:$4 sm:$0xff]  }
  0xd3   : > { %1959 = vmatprep.subr.bf16.mxu0 %v2902_v34 }
  0xd4   : > { %856 = vmatpush1.bf16.msra.mxu1 %v2512_v44  ;;  %v2875_v44 = vld [vmem:[#allocation7 + $0x94] ss:$8 sps:$4 sm:$0xff]  }
  0xd5   : > { %857 = vmatprep.subr.bf16.mxu1 %v2521_v48  ;;  %v2920_v48 = vld [vmem:[#allocation7 + $0x1a4] ss:$8 sps:$4 sm:$0xff]  }
  0xd6   : > { %1960 = vmatpush1.bf16.msra.mxu0 %v2900_v36 }
  0xd8   : > { %858 = vmatpush1.bf16.msra.mxu1 %v2520_v50  ;;  %v2918_v50 = vld [vmem:[#allocation7 + $0x1a0] ss:$8 sps:$4 sm:$0xff]  }
  0xd9   : > { %949 = vmatprep.subr.bf16.mxu1 %v2469_v54  ;;  %v2921_v54 = vld [vmem:[#allocation7 + $0x1b0] ss:$8 sps:$4 sm:$0xff]  }
  0xdb   : > { %876 = vmatmul.mubr.bf16.vlgmr.msra.gmra.mrb[8].mxu1 %v3505_v63 }
  0xdc   : > { %885 = vmatprep.mubr.bf16.mxu1 %v3245_v0  ;;  %950 = vmatpush1.bf16.msra.mxu1 %v2468_v56  ;;  %v2885_v56 = vld [vmem:[#allocation7 + $0xb0] ss:$8 sps:$4 sm:$0xff]  }
  0xdd   : > { %951 = vmatprep.subr.bf16.mxu1 %v2477_v60  ;;  %v2891_v60 = vld [vmem:[#allocation7 + $0xc0] ss:$8 sps:$4 sm:$0xff]  }
  0xe0   : > { %952 = vmatpush1.bf16.msra.mxu1 %v2476_v61  ;;  %v2899_v61 = vld [vmem:[#allocation7 + $0xd4] ss:$8 sps:$4 sm:$0xff]  }
  0xe1   : > { %953 = vmatprep.subr.bf16.mxu1 %v2485_v2  ;;  %v2905_v2 = vld [vmem:[#allocation7 + $0xe4] ss:$8 sps:$4 sm:$0xff]  }
  0xe3   : > { %886 = vmatmul.mubr.bf16.gmra.mrb[12].mxu1 %v3511_v19 }
  0xe4   : > { %954 = vmatpush1.bf16.msra.mxu1 %v2484_v3  ;;  %981 = vmatprep.mubr.bf16.mxu1 %v3245_v0  ;;  %v2932_v3 = vld [vmem:[#allocation7 + $0x1e4] ss:$8 sps:$4 sm:$0xff]  }
  0xe5   : > { %955 = vmatprep.subr.bf16.mxu1 %v2493_v6  ;;  %v2911_v6 = vld [vmem:[#allocation7 + $0xf4] ss:$8 sps:$4 sm:$0xff]  }
  0xe8   : > { %956 = vmatpush1.bf16.msra.mxu1 %v2492_v7  ;;  %v2935_v7 = vld [vmem:[#allocation7 + $0x1f4] ss:$8 sps:$4 sm:$0xff]  }
  0xe9   : > { %957 = vmatprep.subr.bf16.mxu1 %v2501_v10  ;;  %v2938_v10 = vld [vmem:[#allocation7 + $0x204] ss:$8 sps:$4 sm:$0xff]  }
  0xec   : > { %958 = vmatpush1.bf16.msra.mxu1 %v2500_v11  ;;  %v430_v11 = vlaneseq }
  0xed   : > { %959 = vmatprep.subr.bf16.mxu1 %v2509_v14  ;;  %v3528_v14 = vld [vmem:[#allocation6] sm:$0xff] }
  0xee   : > { %v3525_v12 = vshrl.u32 %v430_v11, 7 }
  0xf0   : > { %960 = vmatpush1.bf16.msra.mxu1 %v2508_v15  ;;  %v432_v13 = vsub.s32 0, %v3525_v12  ;;  %v436_v15 = vsub.s32 1, %v3525_v12 }
  0xf1   : > { %961 = vmatprep.subr.bf16.mxu1 %v2517_v18 }
  0xf2   : > { %v433_v16 = vrot.slane %v3528_v14, %v432_v13  ;;  %v437_v17 = vrot.slane %v3528_v14, %v436_v15 }
  0xf4   : > { %962 = vmatpush1.bf16.msra.mxu1 %v2516_v20 }
  0xf5   : > { %963 = vmatprep.subr.bf16.mxu1 %v2525_v21 }
  0xf8   : > { %964 = vmatpush1.bf16.msra.mxu1 %v2524_v22 }
  0xf9   : > { %1894 = vmatprep.subr.bf16.mxu1 %v2842_v23 }
  0xfb   : > { %982 = vmatmul.mubr.bf16.vlgmr.msra.gmra.mrb[16].mxu1 %v3505_v63  ;;  %v2857_v63 = vld [vmem:[#allocation7 + $0x54] ss:$8 sps:$4 sm:$0xff]  }
  0xfc   : > { %1895 = vmatpush1.bf16.msra.mxu1 %v2840_v24  ;;  %991 = vmatprep.mubr.bf16.mxu1 %v3245_v0  ;;  %v2860_v0 = vld [vmem:[#allocation7 + $0x64] ss:$8 sps:$4 sm:$0xff]  }
  0xfd   : > { %1896 = vmatprep.subr.bf16.mxu1 %v2845_v25 }
 0x100   : > { %1897 = vmatpush1.bf16.msra.mxu1 %v2843_v26 }
 0x101   : > { %1898 = vmatprep.subr.bf16.mxu1 %v2848_v27 }
 0x103   : > { %992 = vmatmul.mubr.bf16.gmra.mrb[20].mxu1 %v3511_v19  ;;  %v2908_v19 = vld [vmem:[#allocation7 + $0x174] ss:$8 sps:$4 sm:$0xff]  }
 0x104   : > { %1899 = vmatpush1.bf16.msra.mxu1 %v2846_v28  ;;  %1961 = vmatprep.subr.bf16.mxu0 %v2908_v19 }
 0x105   : > { %1900 = vmatprep.subr.bf16.mxu1 %v2851_v29  ;;  %1962 = vmatpush1.bf16.msra.mxu0 %v2906_v39 }
 0x106   : > { %1963 = vmatprep.subr.bf16.mxu0 %v2914_v41 }
 0x108   : > { %1901 = vmatpush1.bf16.msra.mxu1 %v2849_v30 }
 0x109   : > { %1902 = vmatprep.subr.bf16.mxu1 %v2854_v31  ;;  %1964 = vmatpush1.bf16.msra.mxu0 %v2912_v43  ;;  %v448_v31 = vsub.s32 4, %v3525_v12 }
 0x10a   : > { %1965 = vmatprep.subr.bf16.mxu0 %v2917_v46 }
 0x10b   : > { %v449_v41 = vrot.slane %v3528_v14, %v448_v31 }
 0x10c   : > { %1903 = vmatpush1.bf16.msra.mxu1 %v2852_v32 }
 0x10d   : > { %1904 = vmatprep.subr.bf16.mxu1 %v2857_v63  ;;  %1966 = vmatpush1.bf16.msra.mxu0 %v2915_v45 }
 0x10e   : > { %1967 = vmatprep.subr.bf16.mxu0 %v2920_v48 }
 0x110   : > { %1905 = vmatpush1.bf16.msra.mxu1 %v2855_v33  ;;  %v452_v33 = vsub.s32 5, %v3525_v12 }
 0x111   : > { %1906 = vmatprep.subr.bf16.mxu1 %v2860_v0  ;;  %1968 = vmatpush1.bf16.msra.mxu0 %v2918_v50 }
 0x112   : > { %1969 = vmatprep.subr.bf16.mxu0 %v2923_v51  ;;  %v453_v45 = vrot.slane %v3528_v14, %v452_v33 }
 0x114   : > { %1907 = vmatpush1.bf16.msra.mxu1 %v2858_v35 }
 0x115   : > { %1908 = vmatprep.subr.bf16.mxu1 %v2863_v37  ;;  %1970 = vmatpush1.bf16.msra.mxu0 %v2921_v54 }
 0x116   : > { %1971 = vmatprep.subr.bf16.mxu0 %v2926_v55 }
 0x118   : > { %1909 = vmatpush1.bf16.msra.mxu1 %v2861_v38 }
 0x119   : > { %1910 = vmatprep.subr.bf16.mxu1 %v2869_v40  ;;  %1972 = vmatpush1.bf16.msra.mxu0 %v2924_v58 }
 0x11a   : > { %1973 = vmatprep.subr.bf16.mxu0 %v2929_v59 }
 0x11c   : > { %1911 = vmatpush1.bf16.msra.mxu1 %v2867_v42 }
 0x11d   : > { %1912 = vmatprep.subr.bf16.mxu1 %v2875_v44  ;;  %1974 = vmatpush1.bf16.msra.mxu0 %v2927_v62 }
 0x11e   : > { %1975 = vmatprep.subr.bf16.mxu0 %v2932_v3 }
 0x120   : > { %1913 = vmatpush1.bf16.msra.mxu1 %v2873_v47 }
 0x121   : > { %1914 = vmatprep.subr.bf16.mxu1 %v2881_v49  ;;  %1976 = vmatpush1.bf16.msra.mxu0 %v2930_v5 }
 0x122   : > { %1977 = vmatprep.subr.bf16.mxu0 %v2935_v7 }
 0x124   : > { %1915 = vmatpush1.bf16.msra.mxu1 %v2879_v52 }
 0x125   : > { %1916 = vmatprep.subr.bf16.mxu1 %v2887_v53  ;;  %1978 = vmatpush1.bf16.msra.mxu0 %v2933_v9 }
 0x126   : > { %2000 = vmatprep.subr.bf16.mxu0 %v2938_v10 }
 0x128   : > { %1917 = vmatpush1.bf16.msra.mxu1 %v2885_v56 }
 0x129   : > { %1918 = vmatprep.subr.bf16.mxu1 %v2893_v57 }
 0x12c   : > { %1919 = vmatpush1.bf16.msra.mxu1 %v2891_v60 }
 0x12d   : > { %1920 = vmatprep.subr.bf16.mxu1 %v2899_v61 }
 0x130   : > { %1921 = vmatpush1.bf16.msra.mxu1 %v2897_v1 }
 0x131   : > { %1922 = vmatprep.subr.bf16.mxu1 %v2905_v2 }
 0x134   : > { %1923 = vmatpush1.bf16.msra.mxu1 %v2903_v4 }
 0x135   : > { %1924 = vmatprep.subr.bf16.mxu1 %v2911_v6 }
 0x138   : > { %1925 = vmatpush1.bf16.msra.mxu1 %v2909_v8 }
 0x18e   : > { %v824_v18 = vpop.f32.mrb[0].mxu1  ;;  %v930_v50 = vpop.f32.mrb[0].mxu0 }
 0x18f   : > { %v825_v20 = vadd.f32 %v824_v18, %v433_v16  ;;  %v826_v21 = vpop.f32.mrb[1].mxu1  ;;  %v931_v53 = vadd.f32 %v930_v50, %v449_v41  ;;  %v932_v54 = vpop.f32.mrb[1].mxu0 }
 0x190   : > { %v827_v22 = vadd.f32 %v826_v21, %v437_v17  ;;  %v828_v23 = vpop.f32.mrb[2].mxu1  ;;  %v933_v56 = vadd.f32 %v932_v54, %v453_v45  ;;  %v934_v57 = vpop.f32.mrb[2].mxu0 }
 0x191   : > { %v1034_v24 = vmul.f32 0.01, %v825_v20  ;;  %v829_v25 = vadd.f32 %v828_v23, %v433_v16  ;;  %v830_v26 = vpop.f32.mrb[3].mxu1  ;;  %vm1002_vm0 = vcmp.ge.f32.partialorder %v825_v20, 0.0  ;;  %vm1006_vm8 = vcmp.ge.f32.partialorder %v931_v53, 0.0  ;;  %v936_v61 = vpop.f32.mrb[3].mxu0 }
 0x192   : > { %v1035_v27 = vmul.f32 0.01, %v827_v22  ;;  %v831_v28 = vadd.f32 %v830_v26, %v437_v17  ;;  %vm1003_vm1 = vcmp.ge.f32.partialorder %v827_v22, 0.0  ;;  %v1038_v60 = vmul.f32 0.01, %v931_v53 }
 0x193   : > { %vm1010_vm2 = vcmp.ge.f32.partialorder %v829_v25, 0.0  ;;  %v1042_v29 = vmul.f32 0.01, %v829_v25  ;;  %v1066_v32 = vsel %vm1002_vm0, %v825_v20, %v1034_v24  ;;  %vm1007_vm9 = vcmp.ge.f32.partialorder %v933_v56, 0.0 }
 0x194   : > { %vm1011_vm3 = vcmp.ge.f32.partialorder %v831_v28, 0.0  ;;  %v1043_v30 = vmul.f32 0.01, %v831_v28  ;;  %v1067_v34 = vsel %vm1003_vm1, %v827_v22, %v1035_v27  ;;  %v1039_v1 = vmul.f32 0.01, %v933_v56 }
 0x195   : > { %v1074_v63 = vsel %vm1010_vm2, %v829_v25, %v1042_v29  ;;  %v935_v2 = vadd.f32 %v934_v57, %v449_v41  ;;  %v937_v3 = vadd.f32 %v936_v61, %v453_v45  ;;  %v3541_v4 = vsel %vm1006_vm8, %v931_v53, %v1038_v60 }
 0x196   : > { %v1098_v0 = vpack.c.bf16 %v1074_v63, %v1066_v32  ;;  %v1075_v35 = vsel %vm1011_vm3, %v831_v28, %v1043_v30  ;;  %v834_v36 = vpop.f32.mrb[4].mxu1  ;;  %v3543_v7 = vsel %vm1007_vm9, %v933_v56, %v1039_v1  ;;  %v440_v22 = vsub.s32 2, %v3525_v12 }
 0x197   : > { %v1099_v37 = vpack.c.bf16 %v1075_v35, %v1067_v34  ;;  %v835_v19 = vadd.f32 %v834_v36, %v433_v16  ;;  %v836_v38 = vpop.f32.mrb[5].mxu1  ;;  %vm1014_vm10 = vcmp.ge.f32.partialorder %v935_v2, 0.0  ;;  %v1046_v5 = vmul.f32 0.01, %v935_v2 }
 0x198   : > { %v837_v39 = vadd.f32 %v836_v38, %v437_v17  ;;  %v838_v40 = vpop.f32.mrb[6].mxu1  ;;  %vm1015_vm11 = vcmp.ge.f32.partialorder %v937_v3, 0.0  ;;  %v1047_v6 = vmul.f32 0.01, %v937_v3  ;;  %v940_v9 = vpop.f32.mrb[4].mxu0  ;;  %v444_v28 = vsub.s32 3, %v3525_v12 }
 0x199   : > { %1926 = vmatprep.mubr.bf16.mxu1 %v1099_v37  ;;  %vm1018_vm4 = vcmp.ge.f32.partialorder %v835_v19, 0.0  ;;  %v1050_v42 = vmul.f32 0.01, %v835_v19  ;;  %v839_v43 = vadd.f32 %v838_v40, %v433_v16  ;;  %v840_v44 = vpop.f32.mrb[7].mxu1  ;;  %v3545_v8 = vsel %vm1014_vm10, %v935_v2, %v1046_v5  ;;  %v2939_v5 = vld [vmem:[#allocation7 + $0x210] ss:$8 sps:$4 sm:$0xff]  }
 0x19a   : > { %1927 = vmatmul.mubr.bf16.vlgmr.msra.gmra.mrb[24].mxu1 %v1098_v0  ;;  %vm1019_vm5 = vcmp.ge.f32.partialorder %v837_v39, 0.0  ;;  %v1051_v46 = vmul.f32 0.01, %v837_v39  ;;  %v841_v47 = vadd.f32 %v840_v44, %v437_v17  ;;  %v1102_v10 = vpack.c.bf16 %v3545_v8, %v3541_v4  ;;  %v942_v17 = vpop.f32.mrb[5].mxu0  ;;  %v3037_v4 = vld [vmem:[#allocation9 + $0x10] sm:$0xff]   ;;  %v3038_v8 = vld [vmem:[#allocation9 + $0x58] sm:$0xff]  }
 0x19b   : > { %vm1026_vm6 = vcmp.ge.f32.partialorder %v839_v43, 0.0  ;;  %v1058_v48 = vmul.f32 0.01, %v839_v43  ;;  %v1082_v49 = vsel %vm1018_vm4, %v835_v19, %v1050_v42  ;;  %v3549_v11 = vsel %vm1015_vm11, %v937_v3, %v1047_v6  ;;  %v944_v21 = vpop.f32.mrb[6].mxu0 }
 0x19c   : > { %vm1027_vm7 = vcmp.ge.f32.partialorder %v841_v47, 0.0  ;;  %v1059_v51 = vmul.f32 0.01, %v841_v47  ;;  %v1083_v52 = vsel %vm1019_vm5, %v837_v39, %v1051_v46  ;;  %v941_v16 = vadd.f32 %v940_v9, %v449_v41  ;;  %v946_v25 = vpop.f32.mrb[7].mxu0 }
 0x19d   : > { %v1090_v55 = vsel %vm1026_vm6, %v839_v43, %v1058_v48  ;;  %v1103_v18 = vpack.c.bf16 %v3549_v11, %v3543_v7  ;;  %v943_v20 = vadd.f32 %v942_v17, %v453_v45  ;;  %v945_v24 = vadd.f32 %v944_v21, %v449_v41  ;;  %v2954_v11 = vld [vmem:[#allocation7 + $0x260] ss:$8 sps:$4 sm:$0xff]  }
 0x19e   : > { %v1091_v58 = vsel %vm1027_vm7, %v841_v47, %v1059_v51  ;;  %v1106_v59 = vpack.c.bf16 %v1090_v55, %v1082_v49  ;;  %v1054_v23 = vmul.f32 0.01, %v941_v16  ;;  %vm1022_vm12 = vcmp.ge.f32.partialorder %v941_v16, 0.0  ;;  %v2936_v55 = vld [vmem:[#allocation7 + $0x200] ss:$8 sps:$4 sm:$0xff]  }
 0x19f   : > { %v1107_v62 = vpack.c.bf16 %v1091_v58, %v1083_v52  ;;  %vm1023_vm13 = vcmp.ge.f32.partialorder %v943_v20, 0.0  ;;  %v1055_v26 = vmul.f32 0.01, %v943_v20  ;;  %v947_v27 = vadd.f32 %v946_v25, %v453_v45  ;;  %v2941_v58 = vld [vmem:[#allocation7 + $0x214] ss:$8 sps:$4 sm:$0xff]  }
 0x1a0   : > { %vm1030_vm14 = vcmp.ge.f32.partialorder %v945_v24, 0.0  ;;  %v1062_v29 = vmul.f32 0.01, %v945_v24  ;;  %v3557_v32 = vsel %vm1022_vm12, %v941_v16, %v1054_v23  ;;  %v441_v33 = vrot.slane %v3528_v14, %v440_v22  ;;  %v2944_v16 = vld [vmem:[#allocation7 + $0x224] ss:$8 sps:$4 sm:$0xff]  }
 0x1a1   : > { %1936 = vmatprep.mubr.bf16.mxu1 %v1107_v62  ;;  %vm1031_vm15 = vcmp.ge.f32.partialorder %v947_v27, 0.0  ;;  %v1063_v30 = vmul.f32 0.01, %v947_v27  ;;  %v3555_v31 = vsel %vm1023_vm13, %v943_v20, %v1055_v26  ;;  %v445_v35 = vrot.slane %v3528_v14, %v444_v28  ;;  %v2947_v26 = vld [vmem:[#allocation7 + $0x234] ss:$8 sps:$4 sm:$0xff]  }
 0x1a2   : > { %1937 = vmatmul.mubr.bf16.gmra.mrb[28].mxu1 %v1106_v59  ;;  %v3559_v63 = vsel %vm1030_vm14, %v945_v24, %v1062_v29  ;;  %v2942_v24 = vld [vmem:[#allocation7 + $0x220] ss:$8 sps:$4 sm:$0xff]   ;;  %v2950_v28 = vld [vmem:[#allocation7 + $0x244] ss:$8 sps:$4 sm:$0xff]  }
 0x1a3   : > { %v3562_v0 = vsel %vm1031_vm15, %v947_v27, %v1063_v30  ;;  %v1110_v34 = vpack.c.bf16 %v3559_v63, %v3557_v32  ;;  %v2945_v27 = vld [vmem:[#allocation7 + $0x230] ss:$8 sps:$4 sm:$0xff]   ;;  %v2948_v29 = vld [vmem:[#allocation7 + $0x240] ss:$8 sps:$4 sm:$0xff]   ;;  %v456_v30 = vsub.s32 6, %v3525_v12 }
 0x1a4   : > { %v1111_v36 = vpack.c.bf16 %v3562_v0, %v3555_v31  ;;  %v2998_v31 = vld [vmem:[#allocation7 + $0x344] ss:$8 sps:$4 sm:$0xff]   ;;  %v3039_v0 = vld [vmem:[#allocation9 + $0x18] sm:$0xff]  }
 0x1a5   : > { %v3041_v32 = vld [vmem:[#allocation9 + $0x20] sm:$0xff]   ;;  %v2999_v63 = vld [vmem:[#allocation7 + $0x350] ss:$8 sps:$4 sm:$0xff]  }
 0x1ae   : > { %v877_v37 = vpop.f32.mrb[8].mxu1 }
 0x1af   : > { %v878_v19 = vadd.f32 %v877_v37, %v441_v33  ;;  %v879_v38 = vpop.f32.mrb[9].mxu1  ;;  %v2951_v37 = vld [vmem:[#allocation7 + $0x250] ss:$8 sps:$4 sm:$0xff]  }
 0x1b0   : > { %v880_v39 = vadd.f32 %v879_v38, %v445_v35  ;;  %v881_v40 = vpop.f32.mrb[10].mxu1  ;;  %v2956_v38 = vld [vmem:[#allocation7 + $0x264] ss:$8 sps:$4 sm:$0xff]  }
 0x1b1   : > { %v1036_v41 = vmul.f32 0.01, %v878_v19  ;;  %v882_v42 = vadd.f32 %v881_v40, %v441_v33  ;;  %v883_v43 = vpop.f32.mrb[11].mxu1  ;;  %vm1004_vm0 = vcmp.ge.f32.partialorder %v878_v19, 0.0 }
 0x1b2   : > { %v1037_v44 = vmul.f32 0.01, %v880_v39  ;;  %v884_v45 = vadd.f32 %v883_v43, %v445_v35  ;;  %vm1005_vm1 = vcmp.ge.f32.partialorder %v880_v39, 0.0 }
 0x1b3   : > { %vm1012_vm2 = vcmp.ge.f32.partialorder %v882_v42, 0.0  ;;  %v1044_v46 = vmul.f32 0.01, %v882_v42  ;;  %v1068_v48 = vsel %vm1004_vm0, %v878_v19, %v1036_v41  ;;  %v457_v19 = vrot.slane %v3528_v14, %v456_v30  ;;  %v2959_v41 = vld [vmem:[#allocation7 + $0x274] ss:$8 sps:$4 sm:$0xff]  }
 0x1b4   : > { %vm1013_vm3 = vcmp.ge.f32.partialorder %v884_v45, 0.0  ;;  %v1045_v47 = vmul.f32 0.01, %v884_v45  ;;  %v1069_v51 = vsel %vm1005_vm1, %v880_v39, %v1037_v44  ;;  %v2971_v30 = vld [vmem:[#allocation7 + $0x2b4] ss:$8 sps:$4 sm:$0xff]  }
 0x1b5   : > { %v1076_v49 = vsel %vm1012_vm2, %v882_v42, %v1044_v46 }
 0x1b6   : > { %v1100_v50 = vpack.c.bf16 %v1076_v49, %v1068_v48  ;;  %v1077_v52 = vsel %vm1013_vm3, %v884_v45, %v1045_v47  ;;  %v887_v53 = vpop.f32.mrb[12].mxu1  ;;  %v2957_v49 = vld [vmem:[#allocation7 + $0x270] ss:$8 sps:$4 sm:$0xff]  }
 0x1b7   : > { %v1101_v54 = vpack.c.bf16 %v1077_v52, %v1069_v51  ;;  %v888_v56 = vadd.f32 %v887_v53, %v441_v33  ;;  %v889_v57 = vpop.f32.mrb[13].mxu1  ;;  %v2962_v51 = vld [vmem:[#allocation7 + $0x284] ss:$8 sps:$4 sm:$0xff]  }
 0x1b8   : > { %v890_v59 = vadd.f32 %v889_v57, %v445_v35  ;;  %v891_v60 = vpop.f32.mrb[14].mxu1 }
 0x1b9   : > { %1979 = vmatprep.mubr.bf16.mxu0 %v1101_v54  ;;  %vm1020_vm4 = vcmp.ge.f32.partialorder %v888_v56, 0.0  ;;  %v1052_v61 = vmul.f32 0.01, %v888_v56  ;;  %v892_v62 = vadd.f32 %v891_v60, %v441_v33  ;;  %v893_v1 = vpop.f32.mrb[15].mxu1  ;;  %v2953_v33 = vld [vmem:[#allocation7 + $0x254] ss:$8 sps:$4 sm:$0xff]  }
 0x1ba   : > { %1980 = vmatmul.mubr.bf16.vlgmr.msra.gmra.mrb[8].mxu0 %v1100_v50  ;;  %vm1021_vm5 = vcmp.ge.f32.partialorder %v890_v59, 0.0  ;;  %v1053_v2 = vmul.f32 0.01, %v890_v59  ;;  %v894_v3 = vadd.f32 %v893_v1, %v445_v35  ;;  %v460_v35 = vsub.s32 7, %v3525_v12 }
 0x1bb   : > { %2001 = vmatpush1.bf16.msra.mxu0 %v2936_v55  ;;  %vm1028_vm6 = vcmp.ge.f32.partialorder %v892_v62, 0.0  ;;  %v1060_v6 = vmul.f32 0.01, %v892_v62  ;;  %v1084_v9 = vsel %vm1020_vm4, %v888_v56, %v1052_v61 }
 0x1bc   : > { %2002 = vmatprep.subr.bf16.mxu0 %v2941_v58  ;;  %vm1029_vm7 = vcmp.ge.f32.partialorder %v894_v3, 0.0  ;;  %v1061_v17 = vmul.f32 0.01, %v894_v3  ;;  %v1085_v20 = vsel %vm1021_vm5, %v890_v59, %v1053_v2  ;;  %v461_v39 = vrot.slane %v3528_v14, %v460_v35  ;;  %v2960_v58 = vld [vmem:[#allocation7 + $0x280] ss:$8 sps:$4 sm:$0xff]  }
 0x1bd   : > { %v1092_v21 = vsel %vm1028_vm6, %v892_v62, %v1060_v6  ;;  %v2965_v62 = vld [vmem:[#allocation7 + $0x294] ss:$8 sps:$4 sm:$0xff]   ;;  %v2974_v35 = vld [vmem:[#allocation7 + $0x2c4] ss:$8 sps:$4 sm:$0xff]  }
 0x1be   : > { %v1093_v22 = vsel %vm1029_vm7, %v894_v3, %v1061_v17  ;;  %v1108_v23 = vpack.c.bf16 %v1092_v21, %v1084_v9  ;;  %v2963_v17 = vld [vmem:[#allocation7 + $0x290] ss:$8 sps:$4 sm:$0xff]  }
 0x1bf   : > { %2003 = vmatpush1.bf16.msra.mxu0 %v2939_v5  ;;  %v1109_v25 = vpack.c.bf16 %v1093_v22, %v1085_v20  ;;  %v2968_v22 = vld [vmem:[#allocation7 + $0x2a4] ss:$8 sps:$4 sm:$0xff]  }
 0x1c0   : > { %2004 = vmatprep.subr.bf16.mxu0 %v2944_v16 }
 0x1c1   : > { %1989 = vmatprep.mubr.bf16.mxu0 %v1109_v25 }
 0x1c2   : > { %1990 = vmatmul.mubr.bf16.gmra.mrb[12].mxu0 %v1108_v23 }
 0x1c3   : > { %2005 = vmatpush1.bf16.msra.mxu0 %v2942_v24  ;;  %2032 = vmatprep.mubr.bf16.mxu0 %v1103_v18 }
 0x1c4   : > { %2006 = vmatprep.subr.bf16.mxu0 %v2947_v26 }
 0x1c7   : > { %2007 = vmatpush1.bf16.msra.mxu0 %v2945_v27 }
 0x1c8   : > { %2008 = vmatprep.subr.bf16.mxu0 %v2950_v28  ;;  %v2966_v28 = vld [vmem:[#allocation7 + $0x2a0] ss:$8 sps:$4 sm:$0xff]  }
 0x1cb   : > { %2009 = vmatpush1.bf16.msra.mxu0 %v2948_v29 }
 0x1cc   : > { %2010 = vmatprep.subr.bf16.mxu0 %v2953_v33  ;;  %v2969_v33 = vld [vmem:[#allocation7 + $0x2b0] ss:$8 sps:$4 sm:$0xff]  }
 0x1ce   : > { %v983_v7 = vpop.f32.mrb[16].mxu1 }
 0x1cf   : > { %2011 = vmatpush1.bf16.msra.mxu0 %v2951_v37  ;;  %v984_v18 = vadd.f32 %v983_v7, %v457_v19  ;;  %v985_v40 = vpop.f32.mrb[17].mxu1  ;;  %v2972_v37 = vld [vmem:[#allocation7 + $0x2c0] ss:$8 sps:$4 sm:$0xff]  }
 0x1d0   : > { %2012 = vmatprep.subr.bf16.mxu0 %v2956_v38  ;;  %v986_v42 = vadd.f32 %v985_v40, %v461_v39  ;;  %v987_v43 = vpop.f32.mrb[18].mxu1  ;;  %v2975_v38 = vld [vmem:[#allocation7 + $0x2d0] ss:$8 sps:$4 sm:$0xff]   ;;  %v2978_v7 = vld [vmem:[#allocation7 + $0x2e0] ss:$8 sps:$4 sm:$0xff]  }
 0x1d1   : > { %vm1008_vm8 = vcmp.ge.f32.partialorder %v984_v18, 0.0  ;;  %v1040_v44 = vmul.f32 0.01, %v984_v18  ;;  %v988_v45 = vadd.f32 %v987_v43, %v457_v19  ;;  %v989_v46 = vpop.f32.mrb[19].mxu1  ;;  %v2986_v40 = vld [vmem:[#allocation7 + $0x304] ss:$8 sps:$4 sm:$0xff]  }
 0x1d2   : > { %vm1009_vm9 = vcmp.ge.f32.partialorder %v986_v42, 0.0  ;;  %v1041_v47 = vmul.f32 0.01, %v986_v42  ;;  %v990_v48 = vadd.f32 %v989_v46, %v461_v39  ;;  %v3032_v43 = vld [vmem:[#allocation9 + $0x40] sm:$0xff]   ;;  %v2987_v46 = vld [vmem:[#allocation7 + $0x310] ss:$8 sps:$4 sm:$0xff]  }
 0x1d3   : > { %2013 = vmatpush1.bf16.msra.mxu0 %v2954_v11  ;;  %v3576_v50 = vsel %vm1008_vm8, %v984_v18, %v1040_v44  ;;  %vm1016_vm10 = vcmp.ge.f32.partialorder %v988_v45, 0.0  ;;  %v1048_v14 = vmul.f32 0.01, %v988_v45  ;;  %v2983_v11 = vld [vmem:[#allocation7 + $0x2f4] ss:$8 sps:$4 sm:$0xff]   ;;  %v3033_v44 = vld [vmem:[#allocation9] sm:$0xff]   ;;  %2693 = vmatprep.subr.bf16.mxu1 %v3032_v43 }
 0x1d4   : > { %2014 = vmatprep.subr.bf16.mxu0 %v2959_v41  ;;  %vm1017_vm11 = vcmp.ge.f32.partialorder %v990_v48, 0.0  ;;  %v1049_v52 = vmul.f32 0.01, %v990_v48  ;;  %v3578_v53 = vsel %vm1009_vm9, %v986_v42, %v1041_v47  ;;  %v2981_v18 = vld [vmem:[#allocation7 + $0x2f0] ss:$8 sps:$4 sm:$0xff]   ;;  %2694 = vmatpush3.bf16.msra.mxu1 %v3033_v44 }
 0x1d5   : > { %v3580_v54 = vsel %vm1016_vm10, %v988_v45, %v1048_v14  ;;  %v2984_v41 = vld [vmem:[#allocation7 + $0x300] ss:$8 sps:$4 sm:$0xff]   ;;  %v2989_v42 = vld [vmem:[#allocation7 + $0x314] ss:$8 sps:$4 sm:$0xff]   ;;  %v2992_v47 = vld [vmem:[#allocation7 + $0x324] ss:$8 sps:$4 sm:$0xff]  }
 0x1d6   : > { %v1104_v55 = vpack.c.bf16 %v3580_v54, %v3576_v50  ;;  %v993_v56 = vpop.f32.mrb[20].mxu1  ;;  %v3584_v57 = vsel %vm1017_vm11, %v990_v48, %v1049_v52  ;;  %v3034_v45 = vld [vmem:[#allocation9 + $0x48] sm:$0xff]   ;;  %v3044_v50 = vld [vmem:[#allocation9 + $0x70] sm:$0xff]  }
 0x1d7   : > { %2015 = vmatpush1.bf16.msra.mxu0 %v2957_v49  ;;  %v994_v59 = vadd.f32 %v993_v56, %v457_v19  ;;  %v995_v60 = vpop.f32.mrb[21].mxu1  ;;  %v1105_v61 = vpack.c.bf16 %v3584_v57, %v3578_v53  ;;  %v3035_v48 = vld [vmem:[#allocation9 + $0x8] sm:$0xff]   ;;  %2695 = vmatprep.subr.bf16.mxu1 %v3034_v45  ;;  %v3036_v49 = vld [vmem:[#allocation9 + $0x50] sm:$0xff]  }
 0x1d8   : > { %2016 = vmatprep.subr.bf16.mxu0 %v2962_v51  ;;  %v996_v1 = vadd.f32 %v995_v60, %v461_v39  ;;  %v997_v2 = vpop.f32.mrb[22].mxu1  ;;  %v2990_v14 = vld [vmem:[#allocation7 + $0x320] ss:$8 sps:$4 sm:$0xff]   ;;  %v2995_v51 = vld [vmem:[#allocation7 + $0x334] ss:$8 sps:$4 sm:$0xff]   ;;  %2696 = vmatpush3.bf16.msra.mxu1 %v3035_v48 }
 0x1d9   : > { %vm1024_vm12 = vcmp.ge.f32.partialorder %v994_v59, 0.0  ;;  %v1056_v3 = vmul.f32 0.01, %v994_v59  ;;  %v998_v5 = vadd.f32 %v997_v2, %v457_v19  ;;  %v999_v6 = vpop.f32.mrb[23].mxu1  ;;  %v2977_v19 = vld [vmem:[#allocation7 + $0x2d4] ss:$8 sps:$4 sm:$0xff]   ;;  %2697 = vmatprep.subr.bf16.mxu1 %v3036_v49 }
 0x1da   : > { %vm1025_vm13 = vcmp.ge.f32.partialorder %v996_v1, 0.0  ;;  %v1057_v9 = vmul.f32 0.01, %v996_v1  ;;  %v1000_v16 = vadd.f32 %v999_v6, %v461_v39  ;;  %v2980_v39 = vld [vmem:[#allocation7 + $0x2e4] ss:$8 sps:$4 sm:$0xff]   ;;  %v3045_v54 = vld [vmem:[#allocation9 + $0x30] sm:$0xff]  }
 0x1db   : > { %2017 = vmatpush1.bf16.msra.mxu0 %v2960_v58  ;;  %vm1032_vm14 = vcmp.ge.f32.partialorder %v998_v5, 0.0  ;;  %v1064_v20 = vmul.f32 0.01, %v998_v5  ;;  %v3588_v21 = vsel %vm1024_vm12, %v994_v59, %v1056_v3  ;;  %v2996_v52 = vld [vmem:[#allocation7 + $0x340] ss:$8 sps:$4 sm:$0xff]  }
 0x1dc   : > { %2018 = vmatprep.subr.bf16.mxu0 %v2965_v62  ;;  %vm1033_vm15 = vcmp.ge.f32.partialorder %v1000_v16, 0.0  ;;  %v1065_v23 = vmul.f32 0.01, %v1000_v16  ;;  %v3590_v24 = vsel %vm1025_vm13, %v996_v1, %v1057_v9  ;;  %2698 = vmatpush3.bf16.msra.mxu1 %v3037_v4  ;;  %v3001_v56 = vld [vmem:[#allocation7 + $0x354] ss:$8 sps:$4 sm:$0xff]  }
 0x1dd   : > { %v3592_v25 = vsel %vm1032_vm14, %v998_v5, %v1064_v20  ;;  %2699 = vmatprep.subr.bf16.mxu1 %v3038_v8  ;;  %v3002_v53 = vld [vmem:[#allocation7 + $0x360] ss:$8 sps:$4 sm:$0xff]   ;;  %v3007_v57 = vld [vmem:[#allocation7 + $0x374] ss:$8 sps:$4 sm:$0xff]   ;;  %v3005_v58 = vld [vmem:[#allocation7 + $0x370] ss:$8 sps:$4 sm:$0xff]  }
 0x1de   : > { %v3594_v26 = vsel %vm1033_vm15, %v1000_v16, %v1065_v23  ;;  %v1112_v27 = vpack.c.bf16 %v3592_v25, %v3588_v21  ;;  %v3010_v59 = vld [vmem:[#allocation7 + $0x384] ss:$8 sps:$4 sm:$0xff]   ;;  %v3008_v60 = vld [vmem:[#allocation7 + $0x380] ss:$8 sps:$4 sm:$0xff]   ;;  %v3011_v62 = vld [vmem:[#allocation7 + $0x390] ss:$8 sps:$4 sm:$0xff]  }
 0x1df   : > { %2019 = vmatpush1.bf16.msra.mxu0 %v2963_v17  ;;  %v1113_v29 = vpack.c.bf16 %v3594_v26, %v3590_v24  ;;  %v3016_v1 = vld [vmem:[#allocation7 + $0x3a4] ss:$8 sps:$4 sm:$0xff]   ;;  %v3014_v2 = vld [vmem:[#allocation7 + $0x3a0] ss:$8 sps:$4 sm:$0xff]   ;;  %v3019_v3 = vld [vmem:[#allocation7 + $0x3b4] ss:$8 sps:$4 sm:$0xff]  }
 0x1e0   : > { %2020 = vmatprep.subr.bf16.mxu0 %v2968_v22  ;;  %2700 = vmatpush3.bf16.msra.mxu1 %v3039_v0  ;;  %v3017_v5 = vld [vmem:[#allocation7 + $0x3b0] ss:$8 sps:$4 sm:$0xff]   ;;  %v3022_v6 = vld [vmem:[#allocation7 + $0x3c4] ss:$8 sps:$4 sm:$0xff]   ;;  %v3020_v9 = vld [vmem:[#allocation7 + $0x3c0] ss:$8 sps:$4 sm:$0xff]  }
 0x1e1   : > { %v3025_v16 = vld [vmem:[#allocation7 + $0x3d4] ss:$8 sps:$4 sm:$0xff]   ;;  %v3023_v17 = vld [vmem:[#allocation7 + $0x3d0] ss:$8 sps:$4 sm:$0xff]   ;;  %v3028_v20 = vld [vmem:[#allocation7 + $0x3e4] ss:$8 sps:$4 sm:$0xff]  }
 0x1e2   : > { %v3026_v22 = vld [vmem:[#allocation7 + $0x3e0] ss:$8 sps:$4 sm:$0xff]   ;;  %v3031_v23 = vld [vmem:[#allocation7 + $0x3f4] ss:$8 sps:$4 sm:$0xff]   ;;  %v1242_v21 = vld [vmem:[%s3653_s4] sm:$0x3] }
 0x1e3   : > { %2021 = vmatpush1.bf16.msra.mxu0 %v2966_v28  ;;  %v3029_v28 = vld [vmem:[#allocation7 + $0x3f0] ss:$8 sps:$4 sm:$0xff]   ;;  %v1247_v25 = vrot.slane %v1242_v21, %v432_v13  ;;  %v1251_v26 = vrot.slane %v1242_v21, %v436_v15 }
 0x1e4   : > { %2022 = vmatprep.subr.bf16.mxu0 %v2971_v30  ;;  %v3047_v24 = vld [vmem:[#allocation9 + $0x38] sm:$0xff]  }
 0x1e7   : > { %2023 = vmatpush1.bf16.msra.mxu0 %v2969_v33 }
 0x1e8   : > { %2024 = vmatprep.subr.bf16.mxu0 %v2974_v35 }
 0x1eb   : > { %2025 = vmatpush1.bf16.msra.mxu0 %v2972_v37 }
 0x1ec   : > { %2026 = vmatprep.subr.bf16.mxu0 %v2977_v19 }
 0x1ef   : > { %2027 = vmatpush1.bf16.msra.mxu0 %v2975_v38 }
 0x1f0   : > { %2028 = vmatprep.subr.bf16.mxu0 %v2980_v39 }
 0x1f3   : > { %2029 = vmatpush1.bf16.msra.mxu0 %v2978_v7 }
 0x1f4   : > { %2030 = vmatprep.subr.bf16.mxu0 %v2983_v11  ;;  %v3042_v11 = vld [vmem:[#allocation9 + $0x68] sm:$0xff]  }
 0x1f7   : > { %2031 = vmatpush1.bf16.msra.mxu0 %v2981_v18  ;;  %v3043_v18 = vld [vmem:[#allocation9 + $0x28] sm:$0xff]  }
 0x1f8   : > { %2053 = vmatprep.subr.bf16.mxu0 %v2986_v40 }
 0x1fa   : > { %2033 = vmatmul.mubr.bf16.vlgmr.msra.gmra.mrb[8].mxu0 %v1102_v10  ;;  %v2993_v10 = vld [vmem:[#allocation7 + $0x330] ss:$8 sps:$4 sm:$0xff]  }
 0x1fb   : > { %2054 = vmatpush1.bf16.msra.mxu0 %v2984_v41  ;;  %2042 = vmatprep.mubr.bf16.mxu0 %v1111_v36  ;;  %v3040_v36 = vld [vmem:[#allocation9 + $0x60] sm:$0xff]  }
 0x1fc   : > { %2055 = vmatprep.subr.bf16.mxu0 %v2989_v42  ;;  %2701 = vmatprep.subr.bf16.mxu1 %v3040_v36 }
 0x1fd   : > { %2702 = vmatpush3.bf16.msra.mxu1 %v3041_v32 }
 0x1fe   : > { %2703 = vmatprep.subr.bf16.mxu1 %v3042_v11 }
 0x1ff   : > { %2056 = vmatpush1.bf16.msra.mxu0 %v2987_v46 }
 0x200   : > { %2057 = vmatprep.subr.bf16.mxu0 %v2992_v47 }
 0x201   : > { %2704 = vmatpush3.bf16.msra.mxu1 %v3043_v18 }
 0x202   : > { %2043 = vmatmul.mubr.bf16.gmra.mrb[12].mxu0 %v1110_v34  ;;  %v3004_v34 = vld [vmem:[#allocation7 + $0x364] ss:$8 sps:$4 sm:$0xff]   ;;  %2705 = vmatprep.subr.bf16.mxu1 %v3044_v50 }
 0x203   : > { %2058 = vmatpush1.bf16.msra.mxu0 %v2990_v14  ;;  %2085 = vmatprep.mubr.bf16.mxu0 %v1105_v61  ;;  %v3013_v61 = vld [vmem:[#allocation7 + $0x394] ss:$8 sps:$4 sm:$0xff]  }
 0x204   : > { %2059 = vmatprep.subr.bf16.mxu0 %v2995_v51 }
 0x205   : > { %2706 = vmatpush3.bf16.msra.mxu1 %v3045_v54 }
 0x207   : > { %2060 = vmatpush1.bf16.msra.mxu0 %v2993_v10 }
 0x208   : > { %2061 = vmatprep.subr.bf16.mxu0 %v2998_v31 }
 0x20b   : > { %2062 = vmatpush1.bf16.msra.mxu0 %v2996_v52 }
 0x20c   : > { %2063 = vmatprep.subr.bf16.mxu0 %v3001_v56 }
 0x20f   : > { %2064 = vmatpush1.bf16.msra.mxu0 %v2999_v63 }
 0x210   : > { %2065 = vmatprep.subr.bf16.mxu0 %v3004_v34 }
 0x213   : > { %2066 = vmatpush1.bf16.msra.mxu0 %v3002_v53 }
 0x214   : > { %2067 = vmatprep.subr.bf16.mxu0 %v3007_v57 }
 0x217   : > { %2068 = vmatpush1.bf16.msra.mxu0 %v3005_v58 }
 0x218   : > { %2069 = vmatprep.subr.bf16.mxu0 %v3010_v59 }
 0x21b   : > { %2070 = vmatpush1.bf16.msra.mxu0 %v3008_v60 }
 0x21c   : > { %2071 = vmatprep.subr.bf16.mxu0 %v3013_v61 }
 0x21f   : > { %2072 = vmatpush1.bf16.msra.mxu0 %v3011_v62 }
 0x220   : > { %2073 = vmatprep.subr.bf16.mxu0 %v3016_v1 }
 0x223   : > { %2074 = vmatpush1.bf16.msra.mxu0 %v3014_v2 }
 0x224   : > { %2075 = vmatprep.subr.bf16.mxu0 %v3019_v3 }
 0x227   : > { %2076 = vmatpush1.bf16.msra.mxu0 %v3017_v5 }
 0x228   : > { %2077 = vmatprep.subr.bf16.mxu0 %v3022_v6 }
 0x22b   : > { %2078 = vmatpush1.bf16.msra.mxu0 %v3020_v9 }
 0x22c   : > { %2079 = vmatprep.subr.bf16.mxu0 %v3025_v16 }
 0x22f   : > { %2080 = vmatpush1.bf16.msra.mxu0 %v3023_v17 }
 0x230   : > { %2081 = vmatprep.subr.bf16.mxu0 %v3028_v20 }
 0x233   : > { %2082 = vmatpush1.bf16.msra.mxu0 %v3026_v22 }
 0x234   : > { %2083 = vmatprep.subr.bf16.mxu0 %v3031_v23 }
 0x237   : > { %2084 = vmatpush1.bf16.msra.mxu0 %v3029_v28 }
 0x23a   : > { %2086 = vmatmul.mubr.bf16.vlgmr.msra.gmra.mrb[8].mxu0 %v1104_v55  ;;  %v3046_v55 = vld [vmem:[#allocation9 + $0x78] sm:$0xff]  }
 0x23b   : > { %2095 = vmatprep.mubr.bf16.mxu0 %v1113_v29  ;;  %2707 = vmatprep.subr.bf16.mxu1 %v3046_v55 }
 0x23c   : > { %2708 = vmatpush3.bf16.msra.mxu1 %v3047_v24 }
 0x242   : > { %2096 = vmatmul.mubr.bf16.gmra.mrb[12].mxu0 %v1112_v27 }
 0x26d   : > { %v1928_v30 = vpop.f32.mrb[24].mxu1 }
 0x26e   : > { %v1930_v33 = vpop.f32.mrb[25].mxu1  ;;  %v1929_v27 = vadd.f32 %v1928_v30, %v1247_v25 }
 0x26f   : > { %v1932_v35 = vpop.f32.mrb[26].mxu1  ;;  %v1931_v29 = vadd.f32 %v1930_v33, %v1251_v26  ;;  %v2654_v33 = vld [vmem:[%s3655_s6] ss:$0 sm:$0xff] }
 0x270   : > { %v1934_v37 = vpop.f32.mrb[27].mxu1  ;;  %v1933_v41 = vadd.f32 %v1932_v35, %v1247_v25 }
 0x271   : > { %v1935_v44 = vadd.f32 %v1934_v37, %v1251_v26 }
 0x275   : > { %v1938_v19 = vpop.f32.mrb[28].mxu1 }
 0x276   : > { %v1940_v38 = vpop.f32.mrb[29].mxu1  ;;  %v1939_v15 = vadd.f32 %v1938_v19, %v1247_v25 }
 0x277   : > { %v1942_v39 = vpop.f32.mrb[30].mxu1  ;;  %v1941_v10 = vadd.f32 %v1940_v38, %v1251_v26 }
 0x278   : > { %v1944_v7 = vpop.f32.mrb[31].mxu1  ;;  %v1943_v56 = vadd.f32 %v1942_v39, %v1247_v25 }
 0x279   : > { %v1945_v53 = vadd.f32 %v1944_v7, %v1251_v26 }
 0x30d   : > { %v2087_v40 = vpop.f32.mrb[8].mxu0 }
 0x30e   : > { %v2722_v42 = vadd.f32 %v2087_v40, %v1929_v27  ;;  %v2089_v43 = vpop.f32.mrb[9].mxu0 }
 0x30f   : > { %v2724_v45 = vadd.f32 %v2089_v43, %v1931_v29  ;;  %v2091_v46 = vpop.f32.mrb[10].mxu0 }
 0x310   : > { %v2114_v47 = vmul.f32 0.01, %v2722_v42  ;;  %v2726_v48 = vadd.f32 %v2091_v46, %v1933_v41  ;;  %v2093_v49 = vpop.f32.mrb[11].mxu0  ;;  %vm2106_vm0 = vcmp.ge.f32.partialorder %v2722_v42, 0.0 }
 0x311   : > { %v2115_v14 = vmul.f32 0.01, %v2724_v45  ;;  %v2728_v51 = vadd.f32 %v2093_v49, %v1935_v44  ;;  %vm2107_vm1 = vcmp.ge.f32.partialorder %v2724_v45, 0.0 }
 0x312   : > { %vm2108_vm2 = vcmp.ge.f32.partialorder %v2726_v48, 0.0  ;;  %v2116_v13 = vmul.f32 0.01, %v2726_v48  ;;  %v2122_v4 = vsel %vm2106_vm0, %v2722_v42, %v2114_v47 }
 0x313   : > { %vm2109_vm3 = vcmp.ge.f32.partialorder %v2728_v51, 0.0  ;;  %v2117_v12 = vmul.f32 0.01, %v2728_v51  ;;  %v2123_v36 = vsel %vm2107_vm1, %v2724_v45, %v2115_v14 }
 0x314   : > { %v2124_v8 = vsel %vm2108_vm2, %v2726_v48, %v2116_v13 }
 0x315   : > { %v2130_v31 = vpack.c.bf16 %v2124_v8, %v2122_v4  ;;  %v2097_v0 = vpop.f32.mrb[12].mxu0  ;;  %v2125_v52 = vsel %vm2109_vm3, %v2728_v51, %v2117_v12 }
 0x316   : > { %v2730_v32 = vadd.f32 %v2097_v0, %v1939_v15  ;;  %v2099_v63 = vpop.f32.mrb[13].mxu0  ;;  %v2131_v34 = vpack.c.bf16 %v2125_v52, %v2123_v36 }
 0x317   : > { %v2732_v57 = vadd.f32 %v2099_v63, %v1941_v10  ;;  %v2101_v58 = vpop.f32.mrb[14].mxu0 }
 0x318   : > { %v2118_v59 = vmul.f32 0.01, %v2730_v32  ;;  %v2734_v60 = vadd.f32 %v2101_v58, %v1943_v56  ;;  %v2103_v61 = vpop.f32.mrb[15].mxu0  ;;  %2301 = vmatprep.mubr.bf16.mxu1 %v2131_v34  ;;  %vm2110_vm4 = vcmp.ge.f32.partialorder %v2730_v32, 0.0 }
 0x319   : > { %v2119_v62 = vmul.f32 0.01, %v2732_v57  ;;  %v2736_v1 = vadd.f32 %v2103_v61, %v1945_v53  ;;  %2302 = vmatmul.mubr.bf16.vlgmr.msra.gmra.mrb[32].mxu1 %v2130_v31  ;;  %vm2111_vm5 = vcmp.ge.f32.partialorder %v2732_v57, 0.0 }
 0x31a   : > { %vm2112_vm6 = vcmp.ge.f32.partialorder %v2734_v60, 0.0  ;;  %v2120_v2 = vmul.f32 0.01, %v2734_v60  ;;  %v2126_v5 = vsel %vm2110_vm4, %v2730_v32, %v2118_v59 }
 0x31b   : > { %vm2113_vm7 = vcmp.ge.f32.partialorder %v2736_v1, 0.0  ;;  %v2121_v3 = vmul.f32 0.01, %v2736_v1  ;;  %v2127_v9 = vsel %vm2111_vm5, %v2732_v57, %v2119_v62 }
 0x31c   : > { %v2128_v6 = vsel %vm2112_vm6, %v2734_v60, %v2120_v2 }
 0x31d   : > { %v2129_v16 = vsel %vm2113_vm7, %v2736_v1, %v2121_v3  ;;  %v2132_v17 = vpack.c.bf16 %v2128_v6, %v2126_v5 }
 0x31e   : > { %v2133_v20 = vpack.c.bf16 %v2129_v16, %v2127_v9 }
 0x320   : > { %2309 = vmatprep.mubr.bf16.mxu1 %v2133_v20 }
 0x321   : > { %2310 = vmatmul.mubr.bf16.gmra.mrb[36].mxu1 %v2132_v17 }
 0x3ec   : > { %v2709_v22 = vpop.f32.mrb[32].mxu1 }
 0x3ed   : > { %v2710_v23 = vpop.f32.mrb[33].mxu1 }
 0x3ee   : > { %v2711_v28 = vadd.f32 %v2710_v23, %v2709_v22  ;;  %v2712_v30 = vpop.f32.mrb[34].mxu1 }
 0x3ef   : > { %v2713_v35 = vpop.f32.mrb[35].mxu1 }
 0x3f0   : > { %v2714_v37 = vadd.f32 %v2713_v35, %v2712_v30  ;;  %v2304_v19 = vadd.f32 %v2711_v28, %v2654_v33 }
 0x3f2   : > { %v2307_v38 = vadd.f32 %v2714_v37, %v2654_v33 }
 0x3f4   : > { %v2685_v39 = vpack.c.bf16 %v2307_v38, %v2304_v19  ;;  %v2715_v7 = vpop.f32.mrb[36].mxu1 }
 0x3f5   : > { %v2716_v11 = vpop.f32.mrb[37].mxu1 }
 0x3f6   : > { %2686 = vst [vmem:[%s355_s27] sm:$0xff] %v2685_v39   ;;  %v2717_v18 = vadd.f32 %v2716_v11, %v2715_v7  ;;  %v2718_v50 = vpop.f32.mrb[38].mxu1 }
 0x3f7   : > { %v2719_v54 = vpop.f32.mrb[39].mxu1 }
 0x3f8   : > { %v2720_v55 = vadd.f32 %v2719_v54, %v2718_v50  ;;  %v2312_v24 = vadd.f32 %v2717_v18, %v2654_v33 }
 0x3fa   : > { %v2315_v21 = vadd.f32 %v2720_v55, %v2654_v33 }
 0x3fc   : > { %v2690_v25 = vpack.c.bf16 %v2315_v21, %v2312_v24 }
 0x3fe   : > { %2692 = vst [vmem:[%s355_s27 + $0x8] sm:$0xff] %v2690_v25  }
 0x3ff PF: > { %p19_p6 = scmp.ge.s32.totalorder %s3428_s17, 4   ;;  %s3670_s24 = smov %s3224_s25 }
 0x400   : > { %s3671_s25 = smov %s3228_s26  ;;  %s3672_s26 = smov %s3437_s21 }
 0x401   : > { %s3673_s27 = smov %s3428_s17  ;;  %21 = sbr.rel (!%p19_p6) target bundleno = 5 (0x5), region = 104 }
 0x408   :  { %2360 = vsyncpa [#allocation3], 1 }
 0x409   :  { %2362 = vsyncpa [#allocation3 + $0x1], 1 }
 0x40a   :  { %2363 = vsyncpa [#allocation5], 1 }
 0x40b   :  { %2364 = vsyncpa [#allocation8], 1 }

</bundles_post_ra>
